<compile_context>
chip_gen: v5e
topology: v5e:2x2
jax: 0.10.0
libtpu: 0.0.40
codegen_flags: <defaults>
</compile_context>

<pallas_src>
import numpy as np
import jax
import jax.numpy as jnp
from jax.experimental import pallas as pl
from jax.experimental.pallas import tpu as pltpu


# ----------------------------- configuration -----------------------------
SIZE = 16
SPLIT_COEFS = [1, 2, 4]
HIDDEN_CONV = 32          # ConvAutoEncoder hidden (create_layers default)
HIDDEN_ENCODER = 8        # ConvAutoEncoder out_features
HIDDEN_GCN = 32
NUM_CLASSES = 4
BATCH_SIZE = 2            # b_size


# -------------------- host-side map construction (numpy) -----------------
def create_circular(h, w, max_numb=None, center=None, tolerance=1, min_val=0):
    if center is None:
        center = (w / 2 - 0.5, h / 2 - 0.5)
    dist = np.zeros((h, w))
    for i in range(h):
        for j in range(w):
            dist[i][j] = int(max(abs(i - center[0]), abs(j - center[1])) // tolerance + min_val)
    return dist


def split_tensor(size, split_coefs=None):
    if split_coefs is None:
        split_coefs = [1, 2, 4]
    result = []
    last_val = 0
    for coef in split_coefs:
        step = size // coef
        row_data = []
        for _y in range(0, size, step):
            step_result = []
            for _x in range(0, size, step):
                mask = create_circular(step, step, min_val=last_val)
                last_val = mask[-1][-1] + 1
                step_result.append(mask)
            row_data.append(np.concatenate(step_result, axis=1))
        result.append(np.concatenate(row_data, axis=0))
    return result


def create_border_leng(img_shape, split_coefs=None):
    border_leng = []
    if split_coefs is None:
        split_coefs = [1, 2, 4]
    for coef in split_coefs:
        for _ in range(coef ** 2):
            inp = 2
            for _ in range(img_shape // (2 * coef)):
                border_leng.append(inp)
                inp += 2
    return border_leng


def reshape_2d(array, border_size):
    ptr_st, ptr_end = border_size, len(array) - border_size
    data1 = list(array[:ptr_st])
    data2 = list(array[ptr_end:])
    itt_leng = 4
    while ptr_st != ptr_end:
        if itt_leng > 2:
            data1.append(array[ptr_st])
        else:
            data2.append(array[ptr_st])
        ptr_st += 1
        itt_leng -= 1
        if itt_leng == 0:
            itt_leng = 4
    return np.stack([data1, data2])


GLOBAL_MAP = split_tensor(SIZE, SPLIT_COEFS)
BORDER = create_border_leng(SIZE, SPLIT_COEFS)

# Per node (= per radius "rad"): channel, band gather indices (row-major mask
# order, matching torch boolean masking) and the reshape_2d permutation.
NODE_SPECS = []  # (channel, rows, cols, perm[2, W])
_min_value = 0
for _ch, _vmap in enumerate(GLOBAL_MAP):
    _vm = _vmap.astype(int)
    _max_value = int(_vm[-1][-1])
    for _rad in range(_min_value, _max_value + 1):
        _rows, _cols = np.nonzero(_vm == _rad)
        _perm = reshape_2d(np.arange(len(_rows)), BORDER[_rad]).astype(np.int32)
        NODE_SPECS.append((_ch, _rows.astype(np.int32), _cols.astype(np.int32), _perm))
    _min_value = _max_value + 1

N_NODES = len(NODE_SPECS)
assert N_NODES == len(BORDER)

MAXW = max(spec[3].shape[1] for spec in NODE_SPECS)     # widest (2, W) band
MAXP = MAXW - 1                                         # max conv patches W-1
PHC = MAXP * HIDDEN_CONV                                # flattened conv width

# ---- one fused gather table for the conv im2col taps ----------------------
# tap k -> (band row r, patch offset d): 0:(top,0) 1:(top,1) 2:(bot,0) 3:(bot,1)
# Index j = p*HIDDEN_CONV + c is pre-expanded over conv channels c so the
# encoder kernel is pure 2-D elementwise + one matmul (no in-kernel reshapes).
# Padded positions (p >= wm1) point at flat index 0; their decoder weight rows
# are zero so they contribute nothing.
TAP_IDX_NP = np.zeros((N_NODES, 4, PHC), np.int32)
for _n, (_ch, _rows, _cols, _perm) in enumerate(NODE_SPECS):
    _wn = _perm.shape[1]
    _wm1 = _wn - 1
    _flat = _ch * SIZE * SIZE + _rows[_perm] * SIZE + _cols[_perm]   # (2, wn)
    for _k, (_r, _d) in enumerate([(0, 0), (0, 1), (1, 0), (1, 1)]):
        _tap = np.repeat(_flat[_r, _d:_d + _wm1], HIDDEN_CONV)       # (wm1*HC,)
        TAP_IDX_NP[_n, _k, : _wm1 * HIDDEN_CONV] = _tap
TAP_IDX = jnp.asarray(TAP_IDX_NP)


# ------------------------------ Pallas kernels ----------------------------
def _encoder_kernel(tap_ref, ewt_ref, ebt_ref, dw_ref, db_ref, out_ref):
    """Per-node ConvAutoEncoder: Conv2d(1, HC, 2) + ReLU (as 4 broadcast FMAs on
    the VPU — a K=4 MXU matmul would be near-empty) followed by the decoder
    Linear as one (B, PHC) @ (PHC, HIDDEN_ENCODER) matmul."""
    taps = tap_ref[...]                     # (1, 4, B, PHC) pre-gathered im2col taps
    ewt = ewt_ref[...]                      # (1, 4, 1, PHC) conv weights tiled over patches
    h = (taps[0, 0] * ewt[0, 0]
         + taps[0, 1] * ewt[0, 1]
         + taps[0, 2] * ewt[0, 2]
         + taps[0, 3] * ewt[0, 3]
         + ebt_ref[0])                      # (B, PHC)
    h = jnp.maximum(h, 0.0)
    out = jnp.dot(h, dw_ref[0], preferred_element_type=jnp.float32) + db_ref[0]
    out_ref[0] = out.astype(out_ref.dtype)  # (B, HIDDEN_ENCODER)


def pallas_band_encoder(tap_vals, enc_w_tile, enc_b_tile, dec_w, dec_b):
    """Batched encoder: one launch, grid over the 56 nodes (parallel -> both
    TensorCores on v7x); per-node weights are DMA'd blockwise by the pipeline."""
    return pl.pallas_call(
        _encoder_kernel,
        out_shape=jax.ShapeDtypeStruct((N_NODES, BATCH_SIZE, HIDDEN_ENCODER), jnp.float32),
        grid=(N_NODES,),
        in_specs=[
            pl.BlockSpec((1, 4, BATCH_SIZE, PHC), lambda n: (n, 0, 0, 0)),
            pl.BlockSpec((1, 4, 1, PHC), lambda n: (n, 0, 0, 0)),
            pl.BlockSpec((1, 1, PHC), lambda n: (n, 0, 0)),
            pl.BlockSpec((1, PHC, HIDDEN_ENCODER), lambda n: (n, 0, 0)),
            pl.BlockSpec((1, 1, HIDDEN_ENCODER), lambda n: (n, 0, 0)),
        ],
        out_specs=pl.BlockSpec((1, BATCH_SIZE, HIDDEN_ENCODER), lambda n: (n, 0, 0)),
        compiler_params=pltpu.CompilerParams(dimension_semantics=("parallel",)),
    )(tap_vals, enc_w_tile, enc_b_tile, dec_w, dec_b)


def _gcn_head_kernel(adj_ref, bvec_ref, x_ref, w1_ref, b1_ref, w2_ref, b2_ref,
                     lw_ref, lb_ref, o_ref):
    """Fused: gcn_norm + GCNConv1 + ReLU + GCNConv2 + global_mean_pool +
    Linear + Softmax(dim=1).  Everything stays VMEM/vreg resident."""
    nt = adj_ref.shape[0]
    # A + I (self loops, weight 1) and symmetric normalization, matching
    # torch_geometric gcn_norm (weighted in-degree).
    r = jax.lax.broadcasted_iota(jnp.int32, (nt, nt), 0)
    c = jax.lax.broadcasted_iota(jnp.int32, (nt, nt), 1)
    a = adj_ref[...] + jnp.where(r == c, 1.0, 0.0)
    deg = jnp.sum(a, axis=1, keepdims=True)                      # (nt, 1)
    dinv = jnp.where(deg > 0.0, jax.lax.rsqrt(deg), 0.0)         # D^{-1/2}

    def gcn_conv(h, w, b):
        # D^{-1/2} (A+I) D^{-1/2} (h @ w) + b, with the diagonal scalings applied
        # as row-broadcast multiplies (avoids materializing/transposing A_hat).
        y = jnp.dot(h, w, preferred_element_type=jnp.float32)
        return dinv * jnp.dot(a, dinv * y, preferred_element_type=jnp.float32) + b

    h = jnp.maximum(gcn_conv(x_ref[...], w1_ref[...], b1_ref[...]), 0.0)   # conv1 + relu
    h = gcn_conv(h, w2_ref[...], b2_ref[...])                              # conv2

    # global_mean_pool from the batch vector
    ng = o_ref.shape[0]
    gid = jax.lax.broadcasted_iota(jnp.int32, (ng, nt), 0)
    onehot = (bvec_ref[...] == gid).astype(jnp.float32)          # (ng, nt)
    counts = jnp.maximum(jnp.sum(onehot, axis=1, keepdims=True), 1.0)
    pooled = jnp.dot(onehot, h, preferred_element_type=jnp.float32) / counts

    # TODO(synk): F.dropout(p=0.1, training=True) is stochastic; applied here as eval-mode identity.
    logits = jnp.dot(pooled, lw_ref[...], preferred_element_type=jnp.float32) + lb_ref[...]
    m = jnp.max(logits, axis=-1, keepdims=True)
    e = jnp.exp(logits - m)
    o_ref[...] = (e / jnp.sum(e, axis=-1, keepdims=True)).astype(o_ref.dtype)


def pallas_gcn_head(adj, bvec2d, x, w1, b1, w2, b2, lw, lb):
    nt = adj.shape[0]
    f_in = x.shape[1]
    return pl.pallas_call(
        _gcn_head_kernel,
        out_shape=jax.ShapeDtypeStruct((BATCH_SIZE, NUM_CLASSES), jnp.float32),
        grid=(1,),
        in_specs=[
            pl.BlockSpec((nt, nt), lambda i: (0, 0)),
            pl.BlockSpec((1, nt), lambda i: (0, 0)),
            pl.BlockSpec((nt, f_in), lambda i: (0, 0)),
            pl.BlockSpec((f_in, HIDDEN_GCN), lambda i: (0, 0)),
            pl.BlockSpec((1, HIDDEN_GCN), lambda i: (0, 0)),
            pl.BlockSpec((HIDDEN_GCN, HIDDEN_GCN), lambda i: (0, 0)),
            pl.BlockSpec((1, HIDDEN_GCN), lambda i: (0, 0)),
            pl.BlockSpec((HIDDEN_GCN, NUM_CLASSES), lambda i: (0, 0)),
            pl.BlockSpec((1, NUM_CLASSES), lambda i: (0, 0)),
        ],
        out_specs=pl.BlockSpec((BATCH_SIZE, NUM_CLASSES), lambda i: (0, 0)),
        compiler_params=pltpu.CompilerParams(dimension_semantics=("arbitrary",)),
    )(adj, bvec2d, x, w1, b1, w2, b2, lw, lb)


# --------------------------- JAX glue (graph prep) ------------------------
def build_chain_edge_index(num_graphs, nodes_per_graph):
    srcs, dsts = [], []
    for g in range(num_graphs):
        base = g * nodes_per_graph
        for i in range(nodes_per_graph - 1):
            srcs += [base + i, base + i + 1]
            dsts += [base + i + 1, base + i]
    return np.stack([np.asarray(srcs, np.int32), np.asarray(dsts, np.int32)])


# -------------------------------- forward ---------------------------------
def gcn_forward(params, x, edge_index, batch_vec):
    # --- get_embedding (neural_type='conv'): ONE gather pulls every node's
    #     circular band, already permuted by reshape_2d and expanded into the
    #     four conv taps (padded to the widest band). ------------------------
    xf = x.reshape(BATCH_SIZE, -1)                              # (B, 3*16*16)
    taps = jnp.take(xf, TAP_IDX, axis=1)                        # (B, N, 4, PHC)
    taps = jnp.transpose(taps, (1, 2, 0, 3))                    # (N, 4, B, PHC)

    emb = pallas_band_encoder(taps, params["enc_w_tile"], params["enc_b_tile"],
                              params["dec_w"], params["dec_b"])  # (N, B, hid_enc)

    # x = x.view(batch_size * n_nodes, -1)   (torch stacking order: batch-major)
    h = jnp.transpose(emb, (1, 0, 2)).reshape(BATCH_SIZE * N_NODES, HIDDEN_ENCODER)

    # edges = edge_weight.repeat(batch_size).sigmoid(); dense A built by scatter.
    edges = jax.nn.sigmoid(jnp.tile(params["edge_weight"], BATCH_SIZE))
    nt = BATCH_SIZE * N_NODES
    adj = jnp.zeros((nt, nt), jnp.float32).at[edge_index[1], edge_index[0]].add(edges)

    # conv1 + relu + conv2 + mean-pool + Linear + Softmax fused in one kernel
    return pallas_gcn_head(adj, batch_vec.reshape(1, nt).astype(jnp.int32), h,
                           params["conv1_w"], params["conv1_b"],
                           params["conv2_w"], params["conv2_b"],
                           params["lin_w"], params["lin_b"])


# ----------------------------- parameter init -----------------------------
def init_params(key, edges_per_graph):
    ew_tile = np.zeros((N_NODES, 4, 1, PHC), np.float32)
    eb_tile = np.zeros((N_NODES, 1, PHC), np.float32)
    dec_w = np.zeros((N_NODES, PHC, HIDDEN_ENCODER), np.float32)
    dec_b = np.zeros((N_NODES, 1, HIDDEN_ENCODER), np.float32)
    for n, (_ch, _rows, _cols, perm) in enumerate(NODE_SPECS):
        wm1 = perm.shape[1] - 1                                  # conv output width
        key, k1, k2, k3, k4 = jax.random.split(key, 5)
        enc_w_n = np.asarray(jax.random.normal(k1, (4, HIDDEN_CONV), jnp.float32)) * 0.5
        enc_b_n = np.asarray(jax.random.normal(k2, (1, HIDDEN_CONV), jnp.float32)) * 0.1
        # tile the 2x2 Conv2d taps over all MAXP patch positions (flat j = p*HC + c)
        ew_tile[n, :, 0, :] = np.tile(enc_w_n, (1, MAXP))
        eb_tile[n, 0, :] = np.tile(enc_b_n[0], MAXP)
        dec_in = HIDDEN_CONV * wm1
        dw = np.asarray(jax.random.normal(k3, (dec_in, HIDDEN_ENCODER), jnp.float32)) / np.sqrt(dec_in)
        # torch .flatten() of conv output (HC, 1, wm1) is channel-major (row c*wm1+p);
        # permute rows once host-side to the kernel's (p, c) order and zero-pad to MAXP
        # (zero rows kill any contribution from padded patch positions).
        dw = dw.reshape(HIDDEN_CONV, wm1, HIDDEN_ENCODER).transpose(1, 0, 2).reshape(dec_in, HIDDEN_ENCODER)
        dec_w[n, :dec_in, :] = dw
        dec_b[n] = np.asarray(jax.random.normal(k4, (1, HIDDEN_ENCODER), jnp.float32)) * 0.1

    params = {
        "enc_w_tile": jnp.asarray(ew_tile),
        "enc_b_tile": jnp.asarray(eb_tile),
        "dec_w": jnp.asarray(dec_w),
        "dec_b": jnp.asarray(dec_b),
    }
    key, ke, k1, k2, k3, k4 = jax.random.split(key, 6)
    params["edge_weight"] = jax.random.normal(ke, (edges_per_graph,), jnp.float32)
    params["conv1_w"] = jax.random.normal(k1, (HIDDEN_ENCODER, HIDDEN_GCN), jnp.float32) / np.sqrt(HIDDEN_ENCODER)
    params["conv1_b"] = jnp.zeros((1, HIDDEN_GCN), jnp.float32)
    params["conv2_w"] = jax.random.normal(k2, (HIDDEN_GCN, HIDDEN_GCN), jnp.float32) / np.sqrt(HIDDEN_GCN)
    params["conv2_b"] = jnp.zeros((1, HIDDEN_GCN), jnp.float32)
    params["lin_w"] = jax.random.normal(k3, (HIDDEN_GCN, NUM_CLASSES), jnp.float32) / np.sqrt(HIDDEN_GCN)
    params["lin_b"] = jax.random.normal(k4, (1, NUM_CLASSES), jnp.float32) * 0.1
    return params


# ---------------------------------- main -----------------------------------
if __name__ == "__main__":
    edges_per_graph = 2 * (N_NODES - 1)
    params = init_params(jax.random.PRNGKey(12345), edges_per_graph)

    x = jax.random.normal(jax.random.PRNGKey(0),
                          (BATCH_SIZE, len(SPLIT_COEFS), SIZE, SIZE), jnp.float32)
    edge_index = jnp.asarray(build_chain_edge_index(BATCH_SIZE, N_NODES))
    batch_vec = jnp.repeat(jnp.arange(BATCH_SIZE, dtype=jnp.int32), N_NODES)

    fwd = jax.jit(gcn_forward)
    out = jax.block_until_ready(fwd(params, x, edge_index, batch_vec))

    assert out.shape == (BATCH_SIZE, NUM_CLASSES), out.shape
    assert np.all(np.isfinite(np.asarray(out)))
    assert np.allclose(np.asarray(out).sum(axis=1), 1.0, atol=1e-5)
    print("KERNEL_OK")
</pallas_src>

<mosaic_0001>
module attributes {stable_mosaic.version = 11 : i64} {
  func.func @_encoder_kernel(%arg0: i32, %arg1: memref<1x4x2x928xf32, #tpu.memory_space<vmem>>, %arg2: memref<1x4x1x928xf32, #tpu.memory_space<vmem>>, %arg3: memref<1x1x928xf32, #tpu.memory_space<vmem>>, %arg4: memref<1x928x8xf32, #tpu.memory_space<vmem>>, %arg5: memref<1x1x8xf32, #tpu.memory_space<vmem>>, %arg6: memref<1x2x8xf32, #tpu.memory_space<vmem>>) attributes {dimension_semantics = [#tpu.dimension_semantics<parallel>], iteration_bounds = array<i64: 56>, scalar_prefetch = 0 : i64, scratch_operands = 0 : i64, tpu.core_type = #tpu.core_type<tc>, window_params = [{transform_indices = @transform_0, window_bounds = array<i64: 1, 4, 2, 928>}, {transform_indices = @transform_1, window_bounds = array<i64: 1, 4, 1, 928>}, {transform_indices = @transform_2, window_bounds = array<i64: 1, 1, 928>}, {transform_indices = @transform_3, window_bounds = array<i64: 1, 928, 8>}, {transform_indices = @transform_4, window_bounds = array<i64: 1, 1, 8>}, {transform_indices = @transform_5, window_bounds = array<i64: 1, 2, 8>}]} {
    %c0 = arith.constant 0 : index
    %c0_0 = arith.constant 0 : index
    %c0_1 = arith.constant 0 : index
    %c0_2 = arith.constant 0 : index
    %0 = vector.load %arg1[%c0, %c0_0, %c0_1, %c0_2] : memref<1x4x2x928xf32, #tpu.memory_space<vmem>>, vector<1x4x2x928xf32>
    %c0_3 = arith.constant 0 : index
    %c0_4 = arith.constant 0 : index
    %c0_5 = arith.constant 0 : index
    %c0_6 = arith.constant 0 : index
    %1 = vector.load %arg2[%c0_3, %c0_4, %c0_5, %c0_6] : memref<1x4x1x928xf32, #tpu.memory_space<vmem>>, vector<1x4x1x928xf32>
    %2 = vector.extract_strided_slice %0 {offsets = [0, 0, 0, 0], sizes = [1, 1, 2, 928], strides = [1, 1, 1, 1]} : vector<1x4x2x928xf32> to vector<1x1x2x928xf32>
    %3 = vector.shape_cast %2 : vector<1x1x2x928xf32> to vector<2x928xf32>
    %4 = vector.extract_strided_slice %1 {offsets = [0, 0, 0, 0], sizes = [1, 1, 1, 928], strides = [1, 1, 1, 1]} : vector<1x4x1x928xf32> to vector<1x1x1x928xf32>
    %5 = vector.shape_cast %4 : vector<1x1x1x928xf32> to vector<1x928xf32>
    %6 = vector.broadcast %5 : vector<1x928xf32> to vector<2x928xf32>
    %7 = arith.mulf %3, %6 : vector<2x928xf32>
    %8 = vector.extract_strided_slice %0 {offsets = [0, 1, 0, 0], sizes = [1, 1, 2, 928], strides = [1, 1, 1, 1]} : vector<1x4x2x928xf32> to vector<1x1x2x928xf32>
    %9 = vector.shape_cast %8 : vector<1x1x2x928xf32> to vector<2x928xf32>
    %10 = vector.extract_strided_slice %1 {offsets = [0, 1, 0, 0], sizes = [1, 1, 1, 928], strides = [1, 1, 1, 1]} : vector<1x4x1x928xf32> to vector<1x1x1x928xf32>
    %11 = vector.shape_cast %10 : vector<1x1x1x928xf32> to vector<1x928xf32>
    %12 = vector.broadcast %11 : vector<1x928xf32> to vector<2x928xf32>
    %13 = arith.mulf %9, %12 : vector<2x928xf32>
    %14 = arith.addf %7, %13 : vector<2x928xf32>
    %15 = vector.extract_strided_slice %0 {offsets = [0, 2, 0, 0], sizes = [1, 1, 2, 928], strides = [1, 1, 1, 1]} : vector<1x4x2x928xf32> to vector<1x1x2x928xf32>
    %16 = vector.shape_cast %15 : vector<1x1x2x928xf32> to vector<2x928xf32>
    %17 = vector.extract_strided_slice %1 {offsets = [0, 2, 0, 0], sizes = [1, 1, 1, 928], strides = [1, 1, 1, 1]} : vector<1x4x1x928xf32> to vector<1x1x1x928xf32>
    %18 = vector.shape_cast %17 : vector<1x1x1x928xf32> to vector<1x928xf32>
    %19 = vector.broadcast %18 : vector<1x928xf32> to vector<2x928xf32>
    %20 = arith.mulf %16, %19 : vector<2x928xf32>
    %21 = arith.addf %14, %20 : vector<2x928xf32>
    %22 = vector.extract_strided_slice %0 {offsets = [0, 3, 0, 0], sizes = [1, 1, 2, 928], strides = [1, 1, 1, 1]} : vector<1x4x2x928xf32> to vector<1x1x2x928xf32>
    %23 = vector.shape_cast %22 : vector<1x1x2x928xf32> to vector<2x928xf32>
    %24 = vector.extract_strided_slice %1 {offsets = [0, 3, 0, 0], sizes = [1, 1, 1, 928], strides = [1, 1, 1, 1]} : vector<1x4x1x928xf32> to vector<1x1x1x928xf32>
    %25 = vector.shape_cast %24 : vector<1x1x1x928xf32> to vector<1x928xf32>
    %26 = vector.broadcast %25 : vector<1x928xf32> to vector<2x928xf32>
    %27 = arith.mulf %23, %26 : vector<2x928xf32>
    %28 = arith.addf %21, %27 : vector<2x928xf32>
    %c0_7 = arith.constant 0 : index
    %c0_8 = arith.constant 0 : index
    %c0_9 = arith.constant 0 : index
    %29 = vector.load %arg3[%c0_7, %c0_8, %c0_9] : memref<1x1x928xf32, #tpu.memory_space<vmem>>, vector<1x1x928xf32>
    %30 = vector.shape_cast %29 : vector<1x1x928xf32> to vector<1x928xf32>
    %31 = vector.broadcast %30 : vector<1x928xf32> to vector<2x928xf32>
    %32 = arith.addf %28, %31 : vector<2x928xf32>
    %cst = arith.constant 0.000000e+00 : f32
    %33 = vector.broadcast %cst : f32 to vector<2x928xf32>
    %34 = arith.maximumf %32, %33 : vector<2x928xf32>
    %c0_10 = arith.constant 0 : index
    %c0_11 = arith.constant 0 : index
    %c0_12 = arith.constant 0 : index
    %35 = vector.load %arg4[%c0_10, %c0_11, %c0_12] : memref<1x928x8xf32, #tpu.memory_space<vmem>>, vector<1x928x8xf32>
    %36 = vector.shape_cast %35 : vector<1x928x8xf32> to vector<928x8xf32>
    %cst_13 = arith.constant dense<0.000000e+00> : vector<2x8xf32>
    %37 = tpu.matmul %34, %36, %cst_13 {dimension_numbers = #tpu.dot_dimension_numbers<[1], [0], [0], [1], [0, 0, 1, 1], [], []>} : vector<2x928xf32>, vector<928x8xf32>, vector<2x8xf32> -> vector<2x8xf32>
    %c0_14 = arith.constant 0 : index
    %c0_15 = arith.constant 0 : index
    %c0_16 = arith.constant 0 : index
    %38 = vector.load %arg5[%c0_14, %c0_15, %c0_16] : memref<1x1x8xf32, #tpu.memory_space<vmem>>, vector<1x1x8xf32>
    %39 = vector.shape_cast %38 : vector<1x1x8xf32> to vector<1x8xf32>
    %40 = vector.broadcast %39 : vector<1x8xf32> to vector<2x8xf32>
    %41 = arith.addf %37, %40 : vector<2x8xf32>
    %c0_17 = arith.constant 0 : index
    %c0_18 = arith.constant 0 : index
    %c0_19 = arith.constant 0 : index
    %42 = vector.load %arg6[%c0_17, %c0_18, %c0_19] : memref<1x2x8xf32, #tpu.memory_space<vmem>>, vector<1x2x8xf32>
    %43 = vector.shape_cast %42 : vector<1x2x8xf32> to vector<2x8xf32>
    %44 = vector.shape_cast %41 : vector<2x8xf32> to vector<1x2x8xf32>
    tpu.vector_store %arg6[%c0_17, %c0_18, %c0_19], %44 {strides = array<i32>} : memref<1x2x8xf32, #tpu.memory_space<vmem>>, vector<1x2x8xf32>,
    return
  }
  func.func @transform_0(%arg0: i32) -> (i32, i32, i32, i32) {
    %c0_i32 = arith.constant 0 : i32
    %c0_i32_0 = arith.constant 0 : i32
    %c0_i32_1 = arith.constant 0 : i32
    %c0_i32_2 = arith.constant 0 : i32
    return %arg0, %c0_i32, %c0_i32_0, %c0_i32_1 : i32, i32, i32, i32
  }
  func.func @transform_1(%arg0: i32) -> (i32, i32, i32, i32) {
    %c0_i32 = arith.constant 0 : i32
    %c0_i32_0 = arith.constant 0 : i32
    %c0_i32_1 = arith.constant 0 : i32
    %c0_i32_2 = arith.constant 0 : i32
    return %arg0, %c0_i32, %c0_i32_0, %c0_i32_1 : i32, i32, i32, i32
  }
  func.func @transform_2(%arg0: i32) -> (i32, i32, i32) {
    %c0_i32 = arith.constant 0 : i32
    %c0_i32_0 = arith.constant 0 : i32
    %c0_i32_1 = arith.constant 0 : i32
    return %arg0, %c0_i32, %c0_i32_0 : i32, i32, i32
  }
  func.func @transform_3(%arg0: i32) -> (i32, i32, i32) {
    %c0_i32 = arith.constant 0 : i32
    %c0_i32_0 = arith.constant 0 : i32
    %c0_i32_1 = arith.constant 0 : i32
    return %arg0, %c0_i32, %c0_i32_0 : i32, i32, i32
  }
  func.func @transform_4(%arg0: i32) -> (i32, i32, i32) {
    %c0_i32 = arith.constant 0 : i32
    %c0_i32_0 = arith.constant 0 : i32
    %c0_i32_1 = arith.constant 0 : i32
    return %arg0, %c0_i32, %c0_i32_0 : i32, i32, i32
  }
  func.func @transform_5(%arg0: i32) -> (i32, i32, i32) {
    %c0_i32 = arith.constant 0 : i32
    %c0_i32_0 = arith.constant 0 : i32
    %c0_i32_1 = arith.constant 0 : i32
    return %arg0, %c0_i32, %c0_i32_0 : i32, i32, i32
  }
}

module attributes {stable_mosaic.version = 11 : i64} {
  func.func @_gcn_head_kernel(%arg0: i32, %arg1: memref<112x112xf32, #tpu.memory_space<vmem>>, %arg2: memref<1x112xi32, #tpu.memory_space<vmem>>, %arg3: memref<112x8xf32, #tpu.memory_space<vmem>>, %arg4: memref<8x32xf32, #tpu.memory_space<vmem>>, %arg5: memref<1x32xf32, #tpu.memory_space<vmem>>, %arg6: memref<32x32xf32, #tpu.memory_space<vmem>>, %arg7: memref<1x32xf32, #tpu.memory_space<vmem>>, %arg8: memref<32x4xf32, #tpu.memory_space<vmem>>, %arg9: memref<1x4xf32, #tpu.memory_space<vmem>>, %arg10: memref<2x4xf32, #tpu.memory_space<vmem>>) attributes {dimension_semantics = [#tpu.dimension_semantics<arbitrary>], iteration_bounds = array<i64: 1>, scalar_prefetch = 0 : i64, scratch_operands = 0 : i64, tpu.core_type = #tpu.core_type<tc>, window_params = [{pipeline_mode = #tpu.pipeline_mode<synchronous>, transform_indices = @transform_0, window_bounds = array<i64: 112, 112>}, {pipeline_mode = #tpu.pipeline_mode<synchronous>, transform_indices = @transform_1, window_bounds = array<i64: 1, 112>}, {pipeline_mode = #tpu.pipeline_mode<synchronous>, transform_indices = @transform_2, window_bounds = array<i64: 112, 8>}, {pipeline_mode = #tpu.pipeline_mode<synchronous>, transform_indices = @transform_3, window_bounds = array<i64: 8, 32>}, {pipeline_mode = #tpu.pipeline_mode<synchronous>, transform_indices = @transform_4, window_bounds = array<i64: 1, 32>}, {pipeline_mode = #tpu.pipeline_mode<synchronous>, transform_indices = @transform_5, window_bounds = array<i64: 32, 32>}, {pipeline_mode = #tpu.pipeline_mode<synchronous>, transform_indices = @transform_6, window_bounds = array<i64: 1, 32>}, {pipeline_mode = #tpu.pipeline_mode<synchronous>, transform_indices = @transform_7, window_bounds = array<i64: 32, 4>}, {pipeline_mode = #tpu.pipeline_mode<synchronous>, transform_indices = @transform_8, window_bounds = array<i64: 1, 4>}, {pipeline_mode = #tpu.pipeline_mode<synchronous>, transform_indices = @transform_9, window_bounds = array<i64: 2, 4>}]} {
    %0 = tpu.iota {dimensions = array<i32: 0>} : vector<112x112xi32>
    %1 = tpu.iota {dimensions = array<i32: 1>} : vector<112x112xi32>
    %c0 = arith.constant 0 : index
    %c0_0 = arith.constant 0 : index
    %2 = vector.load %arg1[%c0, %c0_0] : memref<112x112xf32, #tpu.memory_space<vmem>>, vector<112x112xf32>
    %3 = arith.cmpi eq, %0, %1 : vector<112x112xi32>
    %cst = arith.constant 1.000000e+00 : f32
    %cst_1 = arith.constant 0.000000e+00 : f32
    %4 = vector.broadcast %cst : f32 to vector<112x112xf32>
    %5 = vector.broadcast %cst_1 : f32 to vector<112x112xf32>
    %6 = arith.select %3, %4, %5 : vector<112x112xi1>, vector<112x112xf32>
    %7 = arith.addf %2, %6 : vector<112x112xf32>
    %cst_2 = arith.constant dense<0.000000e+00> : vector<112xf32>
    %8 = vector.multi_reduction <add>, %7, %cst_2 [1] : vector<112x112xf32> to vector<112xf32>
    %9 = vector.shape_cast %8 : vector<112xf32> to vector<112x1xf32>
    %cst_3 = arith.constant 0.000000e+00 : f32
    %10 = vector.broadcast %cst_3 : f32 to vector<112x1xf32>
    %11 = arith.cmpf ogt, %9, %10 : vector<112x1xf32>
    %12 = math.rsqrt %9 : vector<112x1xf32>
    %cst_4 = arith.constant 0.000000e+00 : f32
    %13 = vector.broadcast %cst_4 : f32 to vector<112x1xf32>
    %14 = arith.select %11, %12, %13 : vector<112x1xi1>, vector<112x1xf32>
    %c0_5 = arith.constant 0 : index
    %c0_6 = arith.constant 0 : index
    %15 = vector.load %arg3[%c0_5, %c0_6] : memref<112x8xf32, #tpu.memory_space<vmem>>, vector<112x8xf32>
    %c0_7 = arith.constant 0 : index
    %c0_8 = arith.constant 0 : index
    %16 = vector.load %arg4[%c0_7, %c0_8] : memref<8x32xf32, #tpu.memory_space<vmem>>, vector<8x32xf32>
    %c0_9 = arith.constant 0 : index
    %c0_10 = arith.constant 0 : index
    %17 = vector.load %arg5[%c0_9, %c0_10] : memref<1x32xf32, #tpu.memory_space<vmem>>, vector<1x32xf32>
    %cst_11 = arith.constant dense<0.000000e+00> : vector<112x32xf32>
    %18 = tpu.matmul %15, %16, %cst_11 {dimension_numbers = #tpu.dot_dimension_numbers<[1], [0], [0], [1], [0, 0, 1, 1], [], []>} : vector<112x8xf32>, vector<8x32xf32>, vector<112x32xf32> -> vector<112x32xf32>
    %19 = vector.broadcast %14 : vector<112x1xf32> to vector<112x32xf32>
    %20 = arith.mulf %19, %18 : vector<112x32xf32>
    %cst_12 = arith.constant dense<0.000000e+00> : vector<112x32xf32>
    %21 = tpu.matmul %7, %20, %cst_12 {dimension_numbers = #tpu.dot_dimension_numbers<[1], [0], [0], [1], [0, 0, 1, 1], [], []>} : vector<112x112xf32>, vector<112x32xf32>, vector<112x32xf32> -> vector<112x32xf32>
    %22 = vector.broadcast %14 : vector<112x1xf32> to vector<112x32xf32>
    %23 = arith.mulf %22, %21 : vector<112x32xf32>
    %24 = vector.broadcast %17 : vector<1x32xf32> to vector<112x32xf32>
    %25 = arith.addf %23, %24 : vector<112x32xf32>
    %cst_13 = arith.constant 0.000000e+00 : f32
    %26 = vector.broadcast %cst_13 : f32 to vector<112x32xf32>
    %27 = arith.maximumf %25, %26 : vector<112x32xf32>
    %c0_14 = arith.constant 0 : index
    %c0_15 = arith.constant 0 : index
    %28 = vector.load %arg6[%c0_14, %c0_15] : memref<32x32xf32, #tpu.memory_space<vmem>>, vector<32x32xf32>
    %c0_16 = arith.constant 0 : index
    %c0_17 = arith.constant 0 : index
    %29 = vector.load %arg7[%c0_16, %c0_17] : memref<1x32xf32, #tpu.memory_space<vmem>>, vector<1x32xf32>
    %cst_18 = arith.constant dense<0.000000e+00> : vector<112x32xf32>
    %30 = tpu.matmul %27, %28, %cst_18 {dimension_numbers = #tpu.dot_dimension_numbers<[1], [0], [0], [1], [0, 0, 1, 1], [], []>} : vector<112x32xf32>, vector<32x32xf32>, vector<112x32xf32> -> vector<112x32xf32>
    %31 = vector.broadcast %14 : vector<112x1xf32> to vector<112x32xf32>
    %32 = arith.mulf %31, %30 : vector<112x32xf32>
    %cst_19 = arith.constant dense<0.000000e+00> : vector<112x32xf32>
    %33 = tpu.matmul %7, %32, %cst_19 {dimension_numbers = #tpu.dot_dimension_numbers<[1], [0], [0], [1], [0, 0, 1, 1], [], []>} : vector<112x112xf32>, vector<112x32xf32>, vector<112x32xf32> -> vector<112x32xf32>
    %34 = vector.broadcast %14 : vector<112x1xf32> to vector<112x32xf32>
    %35 = arith.mulf %34, %33 : vector<112x32xf32>
    %36 = vector.broadcast %29 : vector<1x32xf32> to vector<112x32xf32>
    %37 = arith.addf %35, %36 : vector<112x32xf32>
    %38 = tpu.iota {dimensions = array<i32: 0>} : vector<2x112xi32>
    %c0_20 = arith.constant 0 : index
    %c0_21 = arith.constant 0 : index
    %39 = vector.load %arg2[%c0_20, %c0_21] : memref<1x112xi32, #tpu.memory_space<vmem>>, vector<1x112xi32>
    %40 = vector.broadcast %39 : vector<1x112xi32> to vector<2x112xi32>
    %41 = arith.cmpi eq, %40, %38 : vector<2x112xi32>
    %42 = arith.extui %41 : vector<2x112xi1> to vector<2x112xi32>
    %43 = arith.sitofp %42 : vector<2x112xi32> to vector<2x112xf32>
    %cst_22 = arith.constant dense<0.000000e+00> : vector<2xf32>
    %44 = vector.multi_reduction <add>, %43, %cst_22 [1] : vector<2x112xf32> to vector<2xf32>
    %45 = vector.shape_cast %44 : vector<2xf32> to vector<2x1xf32>
    %cst_23 = arith.constant 1.000000e+00 : f32
    %46 = vector.broadcast %cst_23 : f32 to vector<2x1xf32>
    %47 = arith.maximumf %45, %46 : vector<2x1xf32>
    %cst_24 = arith.constant dense<0.000000e+00> : vector<2x32xf32>
    %48 = tpu.matmul %43, %37, %cst_24 {dimension_numbers = #tpu.dot_dimension_numbers<[1], [0], [0], [1], [0, 0, 1, 1], [], []>} : vector<2x112xf32>, vector<112x32xf32>, vector<2x32xf32> -> vector<2x32xf32>
    %49 = vector.broadcast %47 : vector<2x1xf32> to vector<2x32xf32>
    %50 = arith.divf %48, %49 : vector<2x32xf32>
    %c0_25 = arith.constant 0 : index
    %c0_26 = arith.constant 0 : index
    %51 = vector.load %arg8[%c0_25, %c0_26] : memref<32x4xf32, #tpu.memory_space<vmem>>, vector<32x4xf32>
    %cst_27 = arith.constant dense<0.000000e+00> : vector<2x4xf32>
    %52 = tpu.matmul %50, %51, %cst_27 {dimension_numbers = #tpu.dot_dimension_numbers<[1], [0], [0], [1], [0, 0, 1, 1], [], []>} : vector<2x32xf32>, vector<32x4xf32>, vector<2x4xf32> -> vector<2x4xf32>
    %c0_28 = arith.constant 0 : index
    %c0_29 = arith.constant 0 : index
    %53 = vector.load %arg9[%c0_28, %c0_29] : memref<1x4xf32, #tpu.memory_space<vmem>>, vector<1x4xf32>
    %54 = vector.broadcast %53 : vector<1x4xf32> to vector<2x4xf32>
    %55 = arith.addf %52, %54 : vector<2x4xf32>
    %cst_30 = arith.constant dense<0xFF800000> : vector<2xf32>
    %56 = vector.multi_reduction <maximumf>, %55, %cst_30 [1] : vector<2x4xf32> to vector<2xf32>
    %57 = vector.shape_cast %56 : vector<2xf32> to vector<2x1xf32>
    %58 = vector.broadcast %57 : vector<2x1xf32> to vector<2x4xf32>
    %59 = arith.subf %55, %58 : vector<2x4xf32>
    %60 = math.exp %59 : vector<2x4xf32>
    %cst_31 = arith.constant dense<0.000000e+00> : vector<2xf32>
    %61 = vector.multi_reduction <add>, %60, %cst_31 [1] : vector<2x4xf32> to vector<2xf32>
    %62 = vector.shape_cast %61 : vector<2xf32> to vector<2x1xf32>
    %63 = vector.broadcast %62 : vector<2x1xf32> to vector<2x4xf32>
    %64 = arith.divf %60, %63 : vector<2x4xf32>
    %c0_32 = arith.constant 0 : index
    %c0_33 = arith.constant 0 : index
    %65 = vector.load %arg10[%c0_32, %c0_33] : memref<2x4xf32, #tpu.memory_space<vmem>>, vector<2x4xf32>
    tpu.vector_store %arg10[%c0_32, %c0_33], %64 {strides = array<i32>} : memref<2x4xf32, #tpu.memory_space<vmem>>, vector<2x4xf32>,
    return
  }
  func.func @transform_0(%arg0: i32) -> (i32, i32) {
    %c0_i32 = arith.constant 0 : i32
    %c0_i32_0 = arith.constant 0 : i32
    %c0_i32_1 = arith.constant 0 : i32
    return %c0_i32, %c0_i32_0 : i32, i32
  }
  func.func @transform_1(%arg0: i32) -> (i32, i32) {
    %c0_i32 = arith.constant 0 : i32
    %c0_i32_0 = arith.constant 0 : i32
    %c0_i32_1 = arith.constant 0 : i32
    return %c0_i32, %c0_i32_0 : i32, i32
  }
  func.func @transform_2(%arg0: i32) -> (i32, i32) {
    %c0_i32 = arith.constant 0 : i32
    %c0_i32_0 = arith.constant 0 : i32
    %c0_i32_1 = arith.constant 0 : i32
    return %c0_i32, %c0_i32_0 : i32, i32
  }
  func.func @transform_3(%arg0: i32) -> (i32, i32) {
    %c0_i32 = arith.constant 0 : i32
    %c0_i32_0 = arith.constant 0 : i32
    %c0_i32_1 = arith.constant 0 : i32
    return %c0_i32, %c0_i32_0 : i32, i32
  }
  func.func @transform_4(%arg0: i32) -> (i32, i32) {
    %c0_i32 = arith.constant 0 : i32
    %c0_i32_0 = arith.constant 0 : i32
    %c0_i32_1 = arith.constant 0 : i32
    return %c0_i32, %c0_i32_0 : i32, i32
  }
  func.func @transform_5(%arg0: i32) -> (i32, i32) {
    %c0_i32 = arith.constant 0 : i32
    %c0_i32_0 = arith.constant 0 : i32
    %c0_i32_1 = arith.constant 0 : i32
    return %c0_i32, %c0_i32_0 : i32, i32
  }
  func.func @transform_6(%arg0: i32) -> (i32, i32) {
    %c0_i32 = arith.constant 0 : i32
    %c0_i32_0 = arith.constant 0 : i32
    %c0_i32_1 = arith.constant 0 : i32
    return %c0_i32, %c0_i32_0 : i32, i32
  }
  func.func @transform_7(%arg0: i32) -> (i32, i32) {
    %c0_i32 = arith.constant 0 : i32
    %c0_i32_0 = arith.constant 0 : i32
    %c0_i32_1 = arith.constant 0 : i32
    return %c0_i32, %c0_i32_0 : i32, i32
  }
  func.func @transform_8(%arg0: i32) -> (i32, i32) {
    %c0_i32 = arith.constant 0 : i32
    %c0_i32_0 = arith.constant 0 : i32
    %c0_i32_1 = arith.constant 0 : i32
    return %c0_i32, %c0_i32_0 : i32, i32
  }
  func.func @transform_9(%arg0: i32) -> (i32, i32) {
    %c0_i32 = arith.constant 0 : i32
    %c0_i32_0 = arith.constant 0 : i32
    %c0_i32_1 = arith.constant 0 : i32
    return %c0_i32, %c0_i32_0 : i32, i32
  }
}

</mosaic_0001>

<bundles_post_ra>
// kernel: gcn_forward.2
= control target key start
LH: loop header
LB: loop body
LE: loop exit
PB: predicated region body
PF: predicated region fallthrough
CT: control target
= control target key end

     0   :  { %s906_s18 = smov 0   ;;  %s1167_s0 = inlined_call_operand.vmem [shape: f32[56,4,2,928], index: 0, kind: input, shape index: {}]   ;;  %s1168_s1 = inlined_call_operand.vmem [shape: f32[56,4,1,928], index: 1, kind: input, shape index: {}]   ;;  %s1169_s2 = inlined_call_operand.vmem [shape: f32[56,1,928], index: 2, kind: input, shape index: {}]   ;;  %s1170_s3 = inlined_call_operand.vmem [shape: f32[56,928,8], index: 3, kind: input, shape index: {}]   ;;  %s1171_s4 = inlined_call_operand.vmem [shape: f32[56,1,8], index: 4, kind: input, shape index: {}]   ;;  %s1172_s5 = inlined_call_operand.vmem [shape: f32[56,2,8], index: 5, kind: output, shape index: {}]  }
   0x1 LB: > { %s843_s19 = sadd.s32 4294967295, %s874_s18   ;;  %p847_p0 = scmp.ge.s32.totalorder %s874_s18, 1  ;;  %s874_s18 = sphi %s906_s18, %s15_s18  }
   0x2   : > { %p223_p1 = scmp.lt.s32.totalorder %s874_s18, 57 }
   0x4   : > { %p224_p2 = pnand %p847_p0, %p223_p1 }
   0x5   : > { %p266_p3 = scmp.lt.s32.totalorder (!%p224_p2), %s843_s19, 55 }
   0x6   : > { %227 = sbr.rel (%p224_p2) target bundleno = 224 (0xe0), region = 40 }
   0xb   : > { %s1174_s19 = smov (!%p266_p3, %s843_s19), 55  ;;  %vm318_vm0 = vcmask 1041408   ;;  %vm320_vm1 = vcmask 1045508   ;;  %vm322_vm2 = vcmask 1043456   ;;  %vm580_vm3 = vcmask 261120  }
   0xc   : > { %s858_s20 = smul.u32 928, %s1174_s19  ;;  %s850_s24 = sshll.u32 %s1174_s19, 5  ;;  %vm743_vm4 = vcmask 58368  }
   0xd   : > { %s987_s27 = scalar_lea.vmem %s1168_s1, %s850_s24  ;;  %s857_s28 = sshll.u32 %s1174_s19, 6 }
   0xe   : > { %s920_s23 = scalar_lea.vmem %s1170_s3, %s858_s20  ;;  %s851_s29 = sshll.u32 %s1174_s19, 3 }
   0xf   : > { %v487_v0 = vld [vmem:[%s920_s23 + $0x178] sm:$0xff]  ;;  %v486_v2 = vld [vmem:[%s920_s23 + $0x170] sm:$0xff]  ;;  %v485_v5 = vld [vmem:[%s920_s23 + $0x168] sm:$0xff]  ;;  %s1009_s7 = scalar_lea.vmem %s1167_s0, %s857_s28  ;;  %s1033_s10 = scalar_lea.vmem %s1169_s2, %s851_s29 }
  0x10   : > { %v455_v1 = vld [vmem:[%s920_s23 + $0x78] sm:$0xff]  ;;  %623 = vmatpush.msra.mxu2 %v487_v0  ;;  %v454_v3 = vld [vmem:[%s920_s23 + $0x70] sm:$0xff]  ;;  %v453_v6 = vld [vmem:[%s920_s23 + $0x68] sm:$0xff]  ;;  %s286_s13 = scalar_lea.vmem %s1171_s4, %s1174_s19  ;;  %s853_s16 = sshll.u32 %s1174_s19, 1 }
  0x11   : > { %583 = vmatpush.msra.mxu0 %v455_v1  ;;  %v471_v4 = vld [vmem:[%s920_s23 + $0xf8] sm:$0xff]  ;;  %v470_v7 = vld [vmem:[%s920_s23 + $0xf0] sm:$0xff]  ;;  %v469_v8 = vld [vmem:[%s920_s23 + $0xe8] sm:$0xff]  ;;  %s290_s21 = scalar_lea.vmem %s1172_s5, %s853_s16 }
  0x12   : > { %603 = vmatpush.msra.mxu1 %v471_v4  ;;  %624 = vmatpush.msra.mxu2 %v486_v2  ;;  %v484_v9 = vld [vmem:[%s920_s23 + $0x160] sm:$0xff]  ;;  %v483_v12 = vld [vmem:[%s920_s23 + $0x158] sm:$0xff]  ;;  %v482_v15 = vld [vmem:[%s920_s23 + $0x150] sm:$0xff] }
  0x13   : > { %584 = vmatpush.msra.mxu0 %v454_v3  ;;  %v452_v10 = vld [vmem:[%s920_s23 + $0x60] sm:$0xff]  ;;  %v451_v13 = vld [vmem:[%s920_s23 + $0x58] sm:$0xff]  ;;  %v450_v16 = vld [vmem:[%s920_s23 + $0x50] sm:$0xff] }
  0x14   : > { %604 = vmatpush.msra.mxu1 %v470_v7  ;;  %625 = vmatpush.msra.mxu2 %v485_v5  ;;  %v468_v11 = vld [vmem:[%s920_s23 + $0xe0] sm:$0xff]  ;;  %v467_v14 = vld [vmem:[%s920_s23 + $0xd8] sm:$0xff]  ;;  %v466_v17 = vld [vmem:[%s920_s23 + $0xd0] sm:$0xff] }
  0x15   : > { %585 = vmatpush.msra.mxu0 %v453_v6  ;;  %v481_v18 = vld [vmem:[%s920_s23 + $0x148] sm:$0xff]  ;;  %v480_v21 = vld [vmem:[%s920_s23 + $0x140] sm:$0xff]  ;;  %v503_v23 = vld [vmem:[%s920_s23 + $0x1f8] sm:$0xff] }
  0x16   : > { %605 = vmatpush.msra.mxu1 %v469_v8  ;;  %626 = vmatpush.msra.mxu2 %v484_v9  ;;  %v449_v19 = vld [vmem:[%s920_s23 + $0x48] sm:$0xff]  ;;  %v448_v22 = vld [vmem:[%s920_s23 + $0x40] sm:$0xff]  ;;  %v502_v25 = vld [vmem:[%s920_s23 + $0x1f0] sm:$0xff] }
  0x17   : > { %586 = vmatpush.msra.mxu0 %v452_v10  ;;  %v465_v20 = vld [vmem:[%s920_s23 + $0xc8] sm:$0xff]  ;;  %v464_v24 = vld [vmem:[%s920_s23 + $0xc0] sm:$0xff]  ;;  %v479_v26 = vld [vmem:[%s920_s23 + $0x138] sm:$0xff]  ;;  %643 = vmatpush.msra.mxu3 %v503_v23 }
  0x18   : > { %606 = vmatpush.msra.mxu1 %v468_v11  ;;  %627 = vmatpush.msra.mxu2 %v483_v12  ;;  %v447_v27 = vld [vmem:[%s920_s23 + $0x38] sm:$0xff]  ;;  %v501_v29 = vld [vmem:[%s920_s23 + $0x1e8] sm:$0xff]  ;;  %v478_v30 = vld [vmem:[%s920_s23 + $0x130] sm:$0xff] }
  0x19   : > { %587 = vmatpush.msra.mxu0 %v451_v13  ;;  %v463_v28 = vld [vmem:[%s920_s23 + $0xb8] sm:$0xff]  ;;  %v446_v31 = vld [vmem:[%s920_s23 + $0x30] sm:$0xff]  ;;  %644 = vmatpush.msra.mxu3 %v502_v25  ;;  %v500_v33 = vld [vmem:[%s920_s23 + $0x1e0] sm:$0xff] }
  0x1a   : > { %607 = vmatpush.msra.mxu1 %v467_v14  ;;  %628 = vmatpush.msra.mxu2 %v482_v15  ;;  %v462_v32 = vld [vmem:[%s920_s23 + $0xb0] sm:$0xff]  ;;  %v477_v34 = vld [vmem:[%s920_s23 + $0x128] sm:$0xff]  ;;  %v499_v37 = vld [vmem:[%s920_s23 + $0x1d8] sm:$0xff] }
  0x1b   : > { %588 = vmatpush.msra.mxu0 %v450_v16  ;;  %v445_v35 = vld [vmem:[%s920_s23 + $0x28] sm:$0xff]  ;;  %645 = vmatpush.msra.mxu3 %v501_v29  ;;  %v476_v38 = vld [vmem:[%s920_s23 + $0x120] sm:$0xff]  ;;  %v498_v41 = vld [vmem:[%s920_s23 + $0x1d0] sm:$0xff] }
  0x1c   : > { %608 = vmatpush.msra.mxu1 %v466_v17  ;;  %629 = vmatpush.msra.mxu2 %v481_v18  ;;  %v461_v36 = vld [vmem:[%s920_s23 + $0xa8] sm:$0xff]  ;;  %v444_v39 = vld [vmem:[%s920_s23 + $0x20] sm:$0xff]  ;;  %v475_v42 = vld [vmem:[%s920_s23 + $0x118] sm:$0xff] }
  0x1d   : > { %589 = vmatpush.msra.mxu0 %v449_v19  ;;  %646 = vmatpush.msra.mxu3 %v500_v33  ;;  %v460_v40 = vld [vmem:[%s920_s23 + $0xa0] sm:$0xff]  ;;  %v443_v43 = vld [vmem:[%s920_s23 + $0x18] sm:$0xff]  ;;  %v497_v45 = vld [vmem:[%s920_s23 + $0x1c8] sm:$0xff] }
  0x1e   : > { %609 = vmatpush.msra.mxu1 %v465_v20  ;;  %630 = vmatpush.msra.mxu2 %v480_v21  ;;  %v459_v44 = vld [vmem:[%s920_s23 + $0x98] sm:$0xff]  ;;  %v474_v46 = vld [vmem:[%s920_s23 + $0x110] sm:$0xff]  ;;  %v496_v49 = vld [vmem:[%s920_s23 + $0x1c0] sm:$0xff] }
  0x1f   : > { %590 = vmatpush.msra.mxu0 %v448_v22  ;;  %647 = vmatpush.msra.mxu3 %v499_v37  ;;  %v442_v47 = vld [vmem:[%s920_s23 + $0x10] sm:$0xff]  ;;  %v473_v50 = vld [vmem:[%s920_s23 + $0x108] sm:$0xff]  ;;  %v495_v53 = vld [vmem:[%s920_s23 + $0x1b8] sm:$0xff] }
  0x20   : > { %610 = vmatpush.msra.mxu1 %v464_v24  ;;  %631 = vmatpush.msra.mxu2 %v479_v26  ;;  %v458_v48 = vld [vmem:[%s920_s23 + $0x90] sm:$0xff]  ;;  %v441_v51 = vld [vmem:[%s920_s23 + $0x8] sm:$0xff]  ;;  %v472_v54 = vld [vmem:[%s920_s23 + $0x100] sm:$0xff] }
  0x21   : > { %591 = vmatpush.msra.mxu0 %v447_v27  ;;  %648 = vmatpush.msra.mxu3 %v498_v41  ;;  %v457_v52 = vld [vmem:[%s920_s23 + $0x88] sm:$0xff]  ;;  %v440_v55 = vld [vmem:[%s920_s23] sm:$0xff]  ;;  %v551_v56 = vld [vmem:[%s920_s23 + $0x378] sm:$0xff] }
  0x22   : > { %611 = vmatpush.msra.mxu1 %v463_v28  ;;  %632 = vmatpush.msra.mxu2 %v478_v30  ;;  %v519_v57 = vld [vmem:[%s920_s23 + $0x278] sm:$0xff]  ;;  %v550_v58 = vld [vmem:[%s920_s23 + $0x370] sm:$0xff]  ;;  %v456_v59 = vld [vmem:[%s920_s23 + $0x80] sm:$0xff] }
  0x23   : > { %592 = vmatpush.msra.mxu0 %v446_v31  ;;  %649 = vmatpush.msra.mxu3 %v497_v45  ;;  %v494_v60 = vld [vmem:[%s920_s23 + $0x1b0] sm:$0xff]  ;;  %v535_v62 = vld [vmem:[%s920_s23 + $0x2f8] sm:$0xff]  ;;  %v549_v63 = vld [vmem:[%s920_s23 + $0x368] sm:$0xff] }
  0x24   : > { %612 = vmatpush.msra.mxu1 %v462_v32  ;;  %633 = vmatpush.msra.mxu2 %v477_v34  ;;  %v518_v61 = vld [vmem:[%s920_s23 + $0x270] sm:$0xff]  ;;  %v517_v0 = vld [vmem:[%s920_s23 + $0x268] sm:$0xff]  ;;  %v548_v3 = vld [vmem:[%s920_s23 + $0x360] sm:$0xff] }
  0x25   : > { %593 = vmatpush.msra.mxu0 %v445_v35  ;;  %650 = vmatpush.msra.mxu3 %v496_v49  ;;  %v534_v1 = vld [vmem:[%s920_s23 + $0x2f0] sm:$0xff]  ;;  %v493_v2 = vld [vmem:[%s920_s23 + $0x1a8] sm:$0xff]  ;;  %v516_v4 = vld [vmem:[%s920_s23 + $0x260] sm:$0xff] }
  0x26   : > { %613 = vmatpush.msra.mxu1 %v461_v36  ;;  %634 = vmatpush.msra.mxu2 %v476_v38  ;;  %v1000_v5 = vld [vmem:[%s987_s27] sm:$0xff]  ;;  %v1003_v6 = vld [vmem:[%s987_s27 + $0x8] sm:$0xff]  ;;  %v1012_v8 = vld [vmem:[%s987_s27 + $0x10] sm:$0xff] }
  0x27   : > { %594 = vmatpush.msra.mxu0 %v444_v39  ;;  %651 = vmatpush.msra.mxu3 %v495_v53  ;;  %v492_v7 = vld [vmem:[%s920_s23 + $0x1a0] sm:$0xff]  ;;  %v304_v9 = vperm.slane %v1000_v5, 0  ;;  %v305_v10 = vperm.slane %v1000_v5, 1  ;;  %v306_v11 = vperm.slane %v1000_v5, 2  ;;  %v307_v12 = vperm.slane %v1000_v5, 3  ;;  %v533_v13 = vld [vmem:[%s920_s23 + $0x2e8] sm:$0xff] }
  0x28   : > { %614 = vmatpush.msra.mxu1 %v460_v40  ;;  %635 = vmatpush.msra.mxu2 %v475_v42  ;;  %v547_v14 = vld [vmem:[%s920_s23 + $0x358] sm:$0xff]  ;;  %v332_v15 = vperm.slane %v1003_v6, 0  ;;  %v333_v16 = vperm.slane %v1003_v6, 1  ;;  %v334_v17 = vperm.slane %v1003_v6, 2  ;;  %v335_v18 = vperm.slane %v1003_v6, 3  ;;  %v532_v25 = vld [vmem:[%s920_s23 + $0x2e0] sm:$0xff] }
  0x29   : > { %595 = vmatpush.msra.mxu0 %v443_v43  ;;  %652 = vmatpush.msra.mxu3 %v494_v60  ;;  %v515_v19 = vld [vmem:[%s920_s23 + $0x258] sm:$0xff]  ;;  %v312_v21 = vrot.slane %v305_v10, 6  ;;  %v313_v22 = vrot.slane %v306_v11, 4  ;;  %v314_v23 = vrot.slane %v307_v12, 2  ;;  %v359_v24 = vperm.slane %v1012_v8, 0  ;;  %v291_v26 = vld [vmem:[%s1009_s7] sm:$0xff] }
  0x2a   : > { %615 = vmatpush.msra.mxu1 %v459_v44  ;;  %636 = vmatpush.msra.mxu2 %v474_v46  ;;  %v491_v20 = vld [vmem:[%s920_s23 + $0x198] sm:$0xff]  ;;  %v340_v27 = vrot.slane %v333_v16, 6  ;;  %v341_v28 = vrot.slane %v334_v17, 4  ;;  %v342_v29 = vrot.slane %v335_v18, 2  ;;  %v360_v30 = vperm.slane %v1012_v8, 1  ;;  %v490_v31 = vld [vmem:[%s920_s23 + $0x190] sm:$0xff] }
  0x2b   : > { %596 = vmatpush.msra.mxu0 %v442_v47  ;;  %653 = vmatpush.msra.mxu3 %v493_v2  ;;  %v293_v32 = vld [vmem:[%s1009_s7 + $0x10] sm:$0xff]  ;;  %v1040_v33 = vld [vmem:[%s987_s27 + $0x18] sm:$0xff]  ;;  %v319_v34 = vsel %vm318_vm0, %v304_v9, %v312_v21  ;;  %v321_v35 = vsel %vm320_vm1, %v313_v22, %v314_v23  ;;  %v361_v36 = vperm.slane %v1012_v8, 2  ;;  %v362_v37 = vperm.slane %v1012_v8, 3  ;;  %v489_v45 = vld [vmem:[%s920_s23 + $0x188] sm:$0xff] }
  0x2c   : > { %616 = vmatpush.msra.mxu1 %v458_v48  ;;  %637 = vmatpush.msra.mxu2 %v473_v50  ;;  %v546_v38 = vld [vmem:[%s920_s23 + $0x350] sm:$0xff]  ;;  %v323_v40 = vsel %vm322_vm2, %v319_v34, %v321_v35  ;;  %v346_v41 = vsel %vm318_vm0, %v332_v15, %v340_v27  ;;  %v347_v42 = vsel %vm320_vm1, %v341_v28, %v342_v29  ;;  %v367_v43 = vrot.slane %v360_v30, 6  ;;  %v531_v44 = vld [vmem:[%s920_s23 + $0x2d8] sm:$0xff]  ;;  %v1055_v50 = vld [vmem:[%s1033_s10] sm:$0xff] }
  0x2d   : > { %597 = vmatpush.msra.mxu0 %v441_v51  ;;  %654 = vmatpush.msra.mxu3 %v492_v7  ;;  %v514_v39 = vld [vmem:[%s920_s23 + $0x250] sm:$0xff]  ;;  %v329_v46 = vmul.f32 %v323_v40, %v291_v26  ;;  %v348_v47 = vsel %vm322_vm2, %v346_v41, %v347_v42  ;;  %v368_v48 = vrot.slane %v361_v36, 4  ;;  %v369_v49 = vrot.slane %v362_v37, 2  ;;  %v545_v51 = vld [vmem:[%s920_s23 + $0x348] sm:$0xff]  ;;  %v295_v53 = vld [vmem:[%s1009_s7 + $0x20] sm:$0xff] }
  0x2e   : > { %617 = vmatpush.msra.mxu1 %v457_v52  ;;  %638 = vmatpush.msra.mxu2 %v472_v54  ;;  %v513_v52 = vld [vmem:[%s920_s23 + $0x248] sm:$0xff]  ;;  %v354_v54 = vmul.f32 %v348_v47, %v293_v32  ;;  %v388_v60 = vperm.slane %v1040_v33, 2  ;;  %v415_v7 = vperm.slane %v1055_v50, 1  ;;  %v543_v15 = vld [vmem:[%s920_s23 + $0x338] sm:$0xff]  ;;  %v297_v17 = vld [vmem:[%s1009_s7 + $0x30] sm:$0xff]  ;;  %v308_v21 = vperm.slane %v1000_v5, 4 }
  0x2f   : > { %598 = vmatpush.msra.mxu0 %v440_v55  ;;  %655 = vmatpush.msra.mxu3 %v491_v20  ;;  %v373_v55 = vsel %vm318_vm0, %v359_v24, %v367_v43  ;;  %v529_v9 = vld [vmem:[%s920_s23 + $0x2c8] sm:$0xff]  ;;  %v511_v16 = vld [vmem:[%s920_s23 + $0x238] sm:$0xff]  ;;  %v528_v22 = vld [vmem:[%s920_s23 + $0x2c0] sm:$0xff]  ;;  %v309_v27 = vperm.slane %v1000_v5, 5  ;;  %v310_v34 = vperm.slane %v1000_v5, 6  ;;  %v336_v40 = vperm.slane %v1003_v6, 4 }
  0x30   : > { %703 = vmatpush.msrb.mxu2 %v551_v56  ;;  %618 = vmatpush.msra.mxu1 %v456_v59  ;;  %v386_v56 = vperm.slane %v1040_v33, 0  ;;  %v374_v59 = vsel %vm320_vm1, %v368_v48, %v369_v49  ;;  %v356_v2 = vadd.f32 %v354_v54, %v329_v46  ;;  %v395_v11 = vrot.slane %v388_v60, 4  ;;  %v554_v26 = vld [vmem:[%s920_s23 + $0x390] sm:$0xff]  ;;  %v527_v35 = vld [vmem:[%s920_s23 + $0x2b8] sm:$0xff]  ;;  %v553_v37 = vld [vmem:[%s920_s23 + $0x388] sm:$0xff] }
  0x31   : > { %663 = vmatpush.msrb.mxu0 %v519_v57  ;;  %656 = vmatpush.msra.mxu3 %v490_v31  ;;  %v387_v57 = vperm.slane %v1040_v33, 1  ;;  %v422_v20 = vrot.slane %v415_v7, 6  ;;  %v542_v28 = vld [vmem:[%s920_s23 + $0x330] sm:$0xff]  ;;  %v541_v41 = vld [vmem:[%s920_s23 + $0x328] sm:$0xff]  ;;  %v338_v46 = vperm.slane %v1003_v6, 6  ;;  %v540_v47 = vld [vmem:[%s920_s23 + $0x320] sm:$0xff] }
  0x32   : > { %704 = vmatpush.msrb.mxu2 %v550_v58  ;;  %683 = vmatpush.msrb.mxu1 %v535_v62  ;;  %v530_v58 = vld [vmem:[%s920_s23 + $0x2d0] sm:$0xff]  ;;  %v414_v62 = vperm.slane %v1055_v50, 0  ;;  %v509_v42 = vld [vmem:[%s920_s23 + $0x228] sm:$0xff]  ;;  %v508_v54 = vld [vmem:[%s920_s23 + $0x220] sm:$0xff]  ;;  %v366_v7 = vperm.slane %v1012_v8, 7 }
  0x33   : > { %664 = vmatpush.msrb.mxu0 %v518_v61  ;;  %v389_v61 = vperm.slane %v1040_v33, 3  ;;  %657 = vmatpush.msra.mxu3 %v489_v45  ;;  %v510_v29 = vld [vmem:[%s920_s23 + $0x230] sm:$0xff]  ;;  %v337_v45 = vperm.slane %v1003_v6, 5 }
  0x34   : > { %705 = vmatpush.msrb.mxu2 %v549_v63  ;;  %684 = vmatpush.msrb.mxu1 %v534_v1  ;;  %v488_v63 = vld [vmem:[%s920_s23 + $0x180] sm:$0xff]  ;;  %v428_v32 = vsel %vm318_vm0, %v414_v62, %v422_v20  ;;  %v523_v20 = vld [vmem:[%s920_s23 + $0x298] sm:$0xff] }
  0x35   : > { %665 = vmatpush.msrb.mxu0 %v517_v0  ;;  %v544_v0 = vld [vmem:[%s920_s23 + $0x340] sm:$0xff]  ;;  %v396_v12 = vrot.slane %v389_v61, 2  ;;  %658 = vmatpush.msra.mxu3 %v488_v63  ;;  %v525_v61 = vld [vmem:[%s920_s23 + $0x2a8] sm:$0xff]  ;;  %v364_v63 = vperm.slane %v1012_v8, 5 }
  0x36   : > { %706 = vmatpush.msrb.mxu2 %v548_v3  ;;  %685 = vmatpush.msrb.mxu1 %v533_v13  ;;  %v512_v1 = vld [vmem:[%s920_s23 + $0x240] sm:$0xff]  ;;  %v375_v3 = vsel %vm322_vm2, %v373_v55, %v374_v59  ;;  %v416_v13 = vperm.slane %v1055_v50, 2  ;;  %v292_v55 = vld [vmem:[%s1009_s7 + $0x8] sm:$0xff]  ;;  %v363_v59 = vperm.slane %v1012_v8, 4 }
  0x37   : > { %666 = vmatpush.msrb.mxu0 %v516_v4  ;;  %v394_v4 = vrot.slane %v387_v57, 6  ;;  %v381_v10 = vmul.f32 %v375_v3, %v295_v53  ;;  %v401_v24 = vsel %vm320_vm1, %v395_v11, %v396_v12  ;;  %v552_v53 = vld [vmem:[%s920_s23 + $0x380] sm:$0xff]  ;;  %v343_v57 = vrot.slane %v337_v45, 6  ;;  %v294_v11 = vld [vmem:[%s1009_s7 + $0x18] sm:$0xff] }
  0x38   : > { %707 = vmatpush.msrb.mxu2 %v547_v14  ;;  %686 = vmatpush.msrb.mxu1 %v532_v25  ;;  %v555_v14 = vld [vmem:[%s920_s23 + $0x398] sm:$0xff]  ;;  %v423_v25 = vrot.slane %v416_v13, 4  ;;  %v370_v13 = vrot.slane %v364_v63, 6  ;;  %v421_v45 = vperm.slane %v1055_v50, 7 }
  0x39   : > { %667 = vmatpush.msrb.mxu0 %v515_v19  ;;  %v400_v18 = vsel %vm318_vm0, %v386_v56, %v394_v4  ;;  %v417_v19 = vperm.slane %v1055_v50, 3  ;;  %v383_v23 = vadd.f32 %v381_v10, %v356_v2  ;;  %735 = vmatpush.msrb.mxu3 %v555_v14  ;;  %v339_v56 = vperm.slane %v1003_v6, 7  ;;  %v507_v6 = vld [vmem:[%s920_s23 + $0x218] sm:$0xff]  ;;  %v524_v10 = vld [vmem:[%s920_s23 + $0x2a0] sm:$0xff] }
  0x3a   : > { %708 = vmatpush.msrb.mxu2 %v546_v38  ;;  %687 = vmatpush.msrb.mxu1 %v531_v44  ;;  %v402_v30 = vsel %vm322_vm2, %v400_v18, %v401_v24  ;;  %v311_v38 = vperm.slane %v1000_v5, 7  ;;  %v316_v44 = vrot.slane %v310_v34, 4  ;;  %v526_v5 = vld [vmem:[%s920_s23 + $0x2b0] sm:$0xff]  ;;  %v349_v4 = vsel %vm318_vm0, %v336_v40, %v343_v57 }
  0x3b   : > { %668 = vmatpush.msrb.mxu0 %v514_v39  ;;  %v424_v31 = vrot.slane %v417_v19, 2  ;;  %v408_v36 = vmul.f32 %v402_v30, %v297_v17  ;;  %v315_v39 = vrot.slane %v309_v27, 6  ;;  %736 = vmatpush.msrb.mxu3 %v554_v26  ;;  %v345_v3 = vrot.slane %v339_v56, 2  ;;  %v537_v26 = vld [vmem:[%s920_s23 + $0x308] sm:$0xff] }
  0x3c   : > { %709 = vmatpush.msrb.mxu2 %v545_v51  ;;  %688 = vmatpush.msrb.mxu1 %v530_v58  ;;  %v317_v51 = vrot.slane %v311_v38, 2  ;;  %v344_v58 = vrot.slane %v338_v46, 4  ;;  %v372_v18 = vrot.slane %v366_v7, 2  ;;  %v391_v19 = vperm.slane %v1040_v33, 5  ;;  %v505_v27 = vld [vmem:[%s920_s23 + $0x208] sm:$0xff]  ;;  %v298_v38 = vld [vmem:[%s1009_s7 + $0x38] sm:$0xff] }
  0x3d   : > { %669 = vmatpush.msrb.mxu0 %v513_v52  ;;  %v429_v43 = vsel %vm320_vm1, %v423_v25, %v424_v31  ;;  %v410_v48 = vadd.f32 %v408_v36, %v383_v23  ;;  %v324_v52 = vsel %vm318_vm0, %v308_v21, %v315_v39  ;;  %737 = vmatpush.msrb.mxu3 %v553_v37  ;;  %v296_v21 = vld [vmem:[%s1009_s7 + $0x28] sm:$0xff]  ;;  %v392_v24 = vperm.slane %v1040_v33, 6  ;;  %v536_v37 = vld [vmem:[%s920_s23 + $0x300] sm:$0xff] }
  0x3e   : > { %710 = vmatpush.msrb.mxu2 %v544_v0  ;;  %689 = vmatpush.msrb.mxu1 %v529_v9  ;;  %v430_v49 = vsel %vm322_vm2, %v428_v32, %v429_v43  ;;  %v325_v62 = vsel %vm320_vm1, %v316_v44, %v317_v51  ;;  %v365_v0 = vperm.slane %v1012_v8, 6  ;;  %v350_v17 = vsel %vm320_vm1, %v344_v58, %v345_v3  ;;  %v522_v32 = vld [vmem:[%s920_s23 + $0x290] sm:$0xff]  ;;  %v504_v43 = vld [vmem:[%s920_s23 + $0x200] sm:$0xff] }
  0x3f   : > { %670 = vmatpush.msrb.mxu0 %v512_v1  ;;  %v436_v60 = vadd.f32 %v430_v49, %v410_v48  ;;  %v539_v1 = vld [vmem:[%s920_s23 + $0x318] sm:$0xff]  ;;  %v326_v2 = vsel %vm322_vm2, %v324_v52, %v325_v62  ;;  %738 = vmatpush.msrb.mxu3 %v552_v53  ;;  %v390_v8 = vperm.slane %v1040_v33, 4  ;;  %v376_v23 = vsel %vm318_vm0, %v363_v59, %v370_v13 }
  0x40   : > { %711 = vmatpush.msrb.mxu2 %v543_v15  ;;  %690 = vmatpush.msrb.mxu1 %v528_v22  ;;  %v330_v12 = vmul.f32 %v326_v2, %v292_v55  ;;  %v371_v14 = vrot.slane %v365_v0, 4  ;;  %v538_v15 = vld [vmem:[%s920_s23 + $0x310] sm:$0xff]  ;;  %v351_v22 = vsel %vm322_vm2, %v349_v4, %v350_v17  ;;  %v393_v25 = vperm.slane %v1040_v33, 7  ;;  %v867_v2 = vld [vmem:[%s286_s13] ss:$0 sm:$0xff] }
  0x41   : > { %671 = vmatpush.msrb.mxu0 %v511_v16  ;;  %v438_v9 = vmax.f32 %v436_v60, 0.0  ;;  %v506_v16 = vld [vmem:[%s920_s23 + $0x210] sm:$0xff]  ;;  %v397_v30 = vrot.slane %v391_v19, 6  ;;  %v418_v31 = vperm.slane %v1055_v50, 4  ;;  %v419_v36 = vperm.slane %v1055_v50, 5 }
  0x42   : > { %712 = vmatpush.msrb.mxu2 %v542_v28  ;;  %691 = vmatpush.msrb.mxu1 %v527_v35  ;;  %v355_v28 = vmul.f32 %v351_v22, %v294_v11  ;;  %v398_v35 = vrot.slane %v392_v24, 4  ;;  %v399_v33 = vrot.slane %v393_v25, 2  ;;  %v427_v52 = vrot.slane %v421_v45, 2 }
  0x43   : > { %672 = vmatpush.msrb.mxu0 %v510_v29  ;;  %562 = vst [vmem:[#allocation1] ss:$4 sm:$0xff] %v438_v9  ;;  %v377_v29 = vsel %vm320_vm1, %v371_v14, %v372_v18  ;;  %v425_v46 = vrot.slane %v419_v36, 6 }
  0x44   : > { %713 = vmatpush.msrb.mxu2 %v541_v41  ;;  %692 = vmatpush.msrb.mxu1 %v526_v5  ;;  %v378_v34 = vsel %vm322_vm2, %v376_v23, %v377_v29  ;;  %v357_v39 = vadd.f32 %v355_v28, %v330_v12  ;;  %v403_v41 = vsel %vm318_vm0, %v390_v8, %v397_v30  ;;  %v521_v5 = vld [vmem:[%s920_s23 + $0x288] sm:$0xff] }
  0x45   : > { %673 = vmatpush.msrb.mxu0 %v509_v42  ;;  %v382_v40 = vmul.f32 %v378_v34, %v296_v21  ;;  %v420_v42 = vperm.slane %v1055_v50, 6  ;;  %v404_v44 = vsel %vm320_vm1, %v398_v35, %v399_v33  ;;  %v431_v53 = vsel %vm318_vm0, %v418_v31, %v425_v46 }
  0x46   : > { %714 = vmatpush.msrb.mxu2 %v540_v47  ;;  %693 = vmatpush.msrb.mxu1 %v525_v61  ;;  %v405_v48 = vsel %vm322_vm2, %v403_v41, %v404_v44 }
  0x47   : > { %674 = vmatpush.msrb.mxu0 %v508_v54  ;;  %v384_v47 = vadd.f32 %v382_v40, %v357_v39  ;;  %v426_v49 = vrot.slane %v420_v42, 4  ;;  %v409_v51 = vmul.f32 %v405_v48, %v298_v38  ;;  %v520_v54 = vld [vmem:[%s920_s23 + $0x280] sm:$0xff] }
  0x48   : > { %715 = vmatpush.msrb.mxu2 %v539_v1  ;;  %694 = vmatpush.msrb.mxu1 %v524_v10 }
  0x49   : > { %675 = vmatpush.msrb.mxu0 %v507_v6  ;;  %v411_v58 = vadd.f32 %v409_v51, %v384_v47  ;;  %v432_v59 = vsel %vm320_vm1, %v426_v49, %v427_v52 }
  0x4a   : > { %716 = vmatpush.msrb.mxu2 %v538_v15  ;;  %695 = vmatpush.msrb.mxu1 %v523_v20  ;;  %v567_v55 = vld.sshfl [vmem:[#allocation1 + $0x10] sm:$0xff pattern:$0x73625140]  ;;  %v565_v56 = vld.sshfl [vmem:[#allocation1] sm:$0xff pattern:$0x73625140]  ;;  %v433_v60 = vsel %vm322_vm2, %v431_v53, %v432_v59 }
  0x4b   : > { %676 = vmatpush.msrb.mxu0 %v506_v16  ;;  %639 = vmatmul.f32.vlgmr.msra.gmra.mxu2 %v567_v55  ;;  %v568_v50 = vld.sshfl [vmem:[#allocation1 + $0x18] sm:$0xff pattern:$0x73625140]  ;;  %v566_v57 = vld.sshfl [vmem:[#allocation1 + $0x8] sm:$0xff pattern:$0x73625140]  ;;  %v437_v61 = vadd.f32 %v433_v60, %v411_v58 }
  0x4c   : > { %717 = vmatpush.msrb.mxu2 %v537_v26  ;;  %696 = vmatpush.msrb.mxu1 %v522_v32 }
  0x4d   : > { %677 = vmatpush.msrb.mxu0 %v505_v27  ;;  %659 = vmatmul.f32.vlgmr.msra.gmra.mxu3 %v568_v50  ;;  %v439_v62 = vmax.f32 %v437_v61, 0.0 }
  0x4e   : > { %718 = vmatpush.msrb.mxu2 %v536_v37  ;;  %697 = vmatpush.msrb.mxu1 %v521_v5 }
  0x4f   : > { %678 = vmatpush.msrb.mxu0 %v504_v43  ;;  %619 = vmatmul.f32.vlgmr.msra.gmra.mxu1 %v566_v57  ;;  %564 = vst [vmem:[#allocation1 + $0x20] ss:$4 sm:$0xff] %v439_v62 }
  0x50   : > { %599 = vmatmul.f32.vlgmr.msra.gmra.mxu0 %v565_v56  ;;  %698 = vmatpush.msrb.mxu1 %v520_v54 }
  0x56   : > { %v571_v63 = vld.sshfl [vmem:[#allocation1 + $0x30] sm:$0xff pattern:$0x73625140]  ;;  %v569_v0 = vld.sshfl [vmem:[#allocation1 + $0x20] sm:$0xff pattern:$0x73625140] }
  0x57   : > { %719 = vmatmul.f32.vlgmr.msrb.gmra.mxu2 %v571_v63  ;;  %v572_v1 = vld.sshfl [vmem:[#allocation1 + $0x38] sm:$0xff pattern:$0x73625140]  ;;  %v570_v6 = vld.sshfl [vmem:[#allocation1 + $0x28] sm:$0xff pattern:$0x73625140] }
  0x58   : > { %679 = vmatmul.f32.vlgmr.msrb.gmra.mxu0 %v569_v0  ;;  %854 = vmatmul.msk.f32.vlgmr.msrb.gmra.mxu3 %vm580_vm3, %v572_v1 }
  0x59   : > { %699 = vmatmul.f32.vlgmr.msrb.gmra.mxu1 %v570_v6 }
  0xcc   : > { %v620_v7 = vpop.f32.mrf.mxu1 }
  0xcd   : > { %v600_v3 = vpop.f32.mrf.mxu0 }
  0xce   : > { %v601_v4 = vadd.f32 %v867_v2, %v600_v3  ;;  %v640_v10 = vpop.f32.mrf.mxu2 }
  0xd0   : > { %v621_v9 = vadd.f32 %v620_v7, %v601_v4  ;;  %v660_v12 = vpop.f32.mrf.mxu3 }
  0xd2   : > { %v641_v11 = vadd.f32 %v640_v10, %v621_v9 }
  0xd4   : > { %v661_v13 = vadd.f32 %v660_v12, %v641_v11 }
  0xd5   : > { %v680_v14 = vpop.f32.mrf.mxu0 }
  0xd6   : > { %v681_v15 = vadd.f32 %v680_v14, %v661_v13  ;;  %v700_v16 = vpop.f32.mrf.mxu1 }
  0xd8   : > { %v701_v17 = vadd.f32 %v700_v16, %v681_v15 }
  0xda   : > { %v720_v18 = vpop.f32.mrf.mxu2 }
  0xdb   : > { %v721_v8 = vadd.f32 %v720_v18, %v701_v17  ;;  %v740_v19 = vpop.f32.mrf.mxu3 }
  0xdd   : > { %v741_v20 = vadd.f32 %v740_v19, %v721_v8 }
  0xdf   : > { %744 = vst.msk [vmem:[%s290_s21] sm:$0x3] %vm743_vm4, %v741_v20 }
  0xe0 PF: > { %s15_s18 = sadd.s32 1, %s874_s18  }
  0xe1   : > { %p12_p4 = scmp.ge.s32.totalorder %s15_s18, 58  }
  0xe3   :  { %14 = sbr.rel (!%p12_p4) target bundleno = 1 (0x1), region = 83 }

// kernel: gcn_forward.3
= control target key start
LH: loop header
LB: loop body
LE: loop exit
PB: predicated region body
PF: predicated region fallthrough
CT: control target
= control target key end

     0   :  { %vm333_vm0 = vcmask 64512   ;;  %v33_v2 = vlaneseq  ;;  %vm1916_vm1 = vcmask 916480   ;;  %v1904_v15 = vmov 0.0   ;;  %s1894_s0 = inlined_call_operand.vmem [shape: f32[112,112], index: 0, kind: input, shape index: {}]   ;;  %s1895_s1 = inlined_call_operand.vmem [shape: s32[1,112], index: 1, kind: input, shape index: {}]   ;;  %s1896_s2 = inlined_call_operand.vmem [shape: f32[112,8], index: 2, kind: input, shape index: {}]   ;;  %s1897_s3 = inlined_call_operand.vmem [shape: f32[8,32], index: 3, kind: input, shape index: {}]   ;;  %s1898_s4 = inlined_call_operand.vmem [shape: f32[1,32], index: 4, kind: input, shape index: {}]   ;;  %s1899_s5 = inlined_call_operand.vmem [shape: f32[32,32], index: 5, kind: input, shape index: {}]   ;;  %s1900_s6 = inlined_call_operand.vmem [shape: f32[1,32], index: 6, kind: input, shape index: {}]   ;;  %s1901_s7 = inlined_call_operand.vmem [shape: f32[32,4], index: 7, kind: input, shape index: {}]   ;;  %s1902_s8 = inlined_call_operand.vmem [shape: f32[1,4], index: 8, kind: input, shape index: {}]   ;;  %s1903_s9 = inlined_call_operand.hbm [shape: f32[2,4], index: 9, kind: output, shape index: {}]  }
   0x1   :  { %v331_v0 = vld [vmem:[%s1897_s3] sm:$0xff]  ;;  %v63_v9 = vld [vmem:[%s1894_s0 + $0x68] sm:$0xff]  ;;  %v61_v10 = vld [vmem:[%s1894_s0 + $0x58] sm:$0xff] }
   0x2   :  { %v317_v1 = vld [vmem:[%s1896_s2] sm:$0xff]  ;;  %391 = vmatpush.msra.mxu0 %v331_v0  ;;  %v1111_v3 = vshrl.u32 %v33_v2, 7  ;;  %v1113_v4 = vand.u32 127, %v33_v2  ;;  %v59_v11 = vld [vmem:[%s1894_s0 + $0x48] sm:$0xff]  ;;  %v60_v25 = vld [vmem:[%s1894_s0 + $0x50] sm:$0xff] }
   0x3   :  { %927 = vmatmul.msk.f32.vlgmr.msra.gmra.mxu0 %vm333_vm0, %v317_v1  ;;  %v318_v14 = vld [vmem:[%s1896_s2 + $0x8] sm:$0xff]  ;;  %v62_v23 = vld [vmem:[%s1894_s0 + $0x60] sm:$0xff] }
   0x4   :  { %1935 = vst [vmem:[#allocation5_spill] sm:$0xff] %v1111_v3  ;;  %v47_v5 = vadd.s32 104, %v1111_v3  ;;  %v45_v6 = vadd.s32 88, %v1111_v3  ;;  %v43_v7 = vadd.s32 72, %v1111_v3  ;;  %v46_v8 = vadd.s32 96, %v1111_v3 }
   0x5   :  { %v44_v12 = vadd.s32 80, %v1111_v3  ;;  %v42_v13 = vadd.s32 64, %v1111_v3  ;;  %v41_v19 = vadd.s32 56, %v1111_v3 }
   0x6   :  { %vm77_vm2 = vcmp.eq.s32.totalorder %v47_v5, %v1113_v4  ;;  %vm75_vm3 = vcmp.eq.s32.totalorder %v45_v6, %v1113_v4  ;;  %vm73_vm4 = vcmp.eq.s32.totalorder %v43_v7, %v1113_v4  ;;  %vm76_vm5 = vcmp.eq.s32.totalorder %v46_v8, %v1113_v4 }
   0x7   :  { %v91_v16 = vsel %vm77_vm2, 1.0, %v1904_v15  ;;  %v89_v17 = vsel %vm75_vm3, 1.0, %v1904_v15  ;;  %v87_v18 = vsel %vm73_vm4, 1.0, %v1904_v15  ;;  %v90_v24 = vsel %vm76_vm5, 1.0, %v1904_v15 }
   0x8   :  { %v1141_v20 = vadd.f32 %v91_v16, %v63_v9  ;;  %v1143_v21 = vadd.f32 %v89_v17, %v61_v10  ;;  %v1145_v22 = vadd.f32 %v87_v18, %v59_v11  ;;  %vm74_vm6 = vcmp.eq.s32.totalorder %v44_v12, %v1113_v4 }
   0x9   :  { %vm72_vm7 = vcmp.eq.s32.totalorder %v42_v13, %v1113_v4 }
   0xa   :  { %1936 = vst [vmem:[#allocation6_spill] sm:$0xff] %v1141_v20 }
   0xb   :  { %1937 = vst [vmem:[#allocation7_spill] sm:$0xff] %v1143_v21 }
   0xc   :  { %1938 = vst [vmem:[#allocation8_spill] sm:$0xff] %v1145_v22 }
   0xd   :  { %14 = vsyncpa [#allocation3], 0  ;;  %928 = vmatmul.msk.f32.gmra.mxu0 %vm333_vm0, %v318_v14  ;;  %v146_v26 = vsel %vm1916_vm1, %v1141_v20, 0.0  ;;  %v140_v27 = vsel %vm1916_vm1, %v1143_v21, 0.0  ;;  %v134_v28 = vsel %vm1916_vm1, %v1145_v22, 0.0  ;;  %v58_v29 = vld [vmem:[%s1894_s0 + $0x40] sm:$0xff]  ;;  %v1169_v33 = vadd.f32 %v90_v24, %v62_v23 }
   0xe   :  { %v40_v30 = vadd.s32 48, %v1111_v3  ;;  %147 = vadd.xlane.f32.xlu0 %v146_v26  ;;  %141 = vadd.xlane.f32.xlu1 %v140_v27  ;;  %v88_v31 = vsel %vm74_vm6, 1.0, %v1904_v15  ;;  %v86_v32 = vsel %vm72_vm7, 1.0, %v1904_v15  ;;  %v39_v36 = vadd.s32 40, %v1111_v3  ;;  %v319_v37 = vld [vmem:[%s1896_s2 + $0x10] sm:$0xff]  ;;  %v57_v41 = vld [vmem:[%s1894_s0 + $0x38] sm:$0xff] }
   0xf   :  { %135 = vadd.xlane.f32.xlu2 %v134_v28  ;;  %1939 = vst [vmem:[#allocation9_spill] sm:$0xff] %v1169_v33  ;;  %v1171_v34 = vadd.f32 %v88_v31, %v60_v25  ;;  %v1173_v35 = vadd.f32 %v86_v32, %v58_v29  ;;  %vm71_vm8 = vcmp.eq.s32.totalorder %v41_v19, %v1113_v4  ;;  %v143_v38 = vsel %vm1916_vm1, %v1169_v33, 0.0  ;;  %v56_v43 = vld [vmem:[%s1894_s0 + $0x30] sm:$0xff]  ;;  %v55_v45 = vld [vmem:[%s1894_s0 + $0x28] sm:$0xff]  ;;  %v320_v53 = vld [vmem:[%s1896_s2 + $0x18] sm:$0xff]  ;;  %s918_s19 = sshll.u32 %s1903_s9, 4  ;;  %s919_s19 = int_to_ptr.hbm [resolvable:$true] %s918_s19 }
  0x10   :  { %vm70_vm9 = vcmp.eq.s32.totalorder %v40_v30, %v1113_v4  ;;  %vm69_vm10 = vcmp.eq.s32.totalorder %v39_v36, %v1113_v4  ;;  %v85_v42 = vsel %vm71_vm8, 1.0, %v1904_v15  ;;  %v38_v47 = vadd.s32 32, %v1111_v3  ;;  %v54_v57 = vld [vmem:[%s1894_s0 + $0x20] sm:$0xff]  ;;  %v53_v59 = vld [vmem:[%s1894_s0 + $0x18] sm:$0xff]  ;;  %v52_v61 = vld [vmem:[%s1894_s0 + $0x10] sm:$0xff] }
  0x11   :  { %1940 = vst [vmem:[#allocation10_spill] sm:$0xff] %v1171_v34  ;;  %v137_v39 = vsel %vm1916_vm1, %v1171_v34, 0.0  ;;  %v131_v40 = vsel %vm1916_vm1, %v1173_v35, 0.0  ;;  %v84_v44 = vsel %vm70_vm9, 1.0, %v1904_v15  ;;  %v83_v46 = vsel %vm69_vm10, 1.0, %v1904_v15  ;;  %v321_v5 = vld [vmem:[%s1896_s2 + $0x20] sm:$0xff] }
  0x12   :  { %1941 = vst [vmem:[#allocation11_spill] sm:$0xff] %v1173_v35  ;;  %v37_v48 = vadd.s32 24, %v1111_v3  ;;  %v36_v49 = vadd.s32 16, %v1111_v3  ;;  %v1204_v50 = vadd.f32 %v85_v42, %v57_v41  ;;  %v1206_v51 = vadd.f32 %v84_v44, %v56_v43  ;;  %v50_v9 = vld [vmem:[%s1894_s0] sm:$0xff]  ;;  %v322_v14 = vld [vmem:[%s1896_s2 + $0x28] sm:$0xff]  ;;  %v323_v18 = vld [vmem:[%s1896_s2 + $0x30] sm:$0xff] }
  0x13   :  { %v1208_v52 = vadd.f32 %v83_v46, %v55_v45  ;;  %vm68_vm11 = vcmp.eq.s32.totalorder %v38_v47, %v1113_v4  ;;  %v35_v63 = vadd.s32 8, %v1111_v3  ;;  %vm64_vm14 = vcmp.eq.s32.totalorder %v1111_v3, %v1113_v4  ;;  %v324_v19 = vld [vmem:[%s1896_s2 + $0x38] sm:$0xff]  ;;  %v325_v23 = vld [vmem:[%s1896_s2 + $0x40] sm:$0xff]  ;;  %v326_v24 = vld [vmem:[%s1896_s2 + $0x48] sm:$0xff] }
  0x14   :  { %1942 = vst [vmem:[#allocation12_spill] sm:$0xff] %v1204_v50  ;;  %vm67_vm12 = vcmp.eq.s32.totalorder %v37_v48, %v1113_v4  ;;  %vm66_vm13 = vcmp.eq.s32.totalorder %v36_v49, %v1113_v4  ;;  %v128_v54 = vsel %vm1916_vm1, %v1204_v50, 0.0  ;;  %v125_v55 = vsel %vm1916_vm1, %v1206_v51, 0.0  ;;  %v327_v25 = vld [vmem:[%s1896_s2 + $0x50] sm:$0xff]  ;;  %v328_v26 = vld [vmem:[%s1896_s2 + $0x58] sm:$0xff]  ;;  %v329_v27 = vld [vmem:[%s1896_s2 + $0x60] sm:$0xff] }
  0x15   :  { %929 = vmatmul.msk.f32.gmra.mxu0 %vm333_vm0, %v319_v37  ;;  %1943 = vst [vmem:[#allocation13_spill] sm:$0xff] %v1206_v51  ;;  %v122_v56 = vsel %vm1916_vm1, %v1208_v52, 0.0  ;;  %v82_v58 = vsel %vm68_vm11, 1.0, %v1904_v15  ;;  %v81_v60 = vsel %vm67_vm12, 1.0, %v1904_v15  ;;  %v80_v62 = vsel %vm66_vm13, 1.0, %v1904_v15  ;;  %v330_v28 = vld [vmem:[%s1896_s2 + $0x68] sm:$0xff] }
  0x16   :  { %144 = vadd.xlane.f32.xlu0 %v143_v38  ;;  %138 = vadd.xlane.f32.xlu1 %v137_v39  ;;  %1944 = vst [vmem:[#allocation14_spill] sm:$0xff] %v1208_v52  ;;  %v1236_v0 = vadd.f32 %v82_v58, %v54_v57  ;;  %v1238_v1 = vadd.f32 %v81_v60, %v53_v59  ;;  %v78_v10 = vsel %vm64_vm14, 1.0, %v1904_v15 }
  0x17   :  { %132 = vadd.xlane.f32.xlu2 %v131_v40  ;;  %v1240_v2 = vadd.f32 %v80_v62, %v52_v61  ;;  %vm65_vm15 = vcmp.eq.s32.totalorder %v35_v63, %v1113_v4  ;;  %v51_v4 = vld [vmem:[%s1894_s0 + $0x8] sm:$0xff]  ;;  %v1263_v12 = vadd.f32 %v78_v10, %v50_v9 }
  0x18   :  { %1945 = vst [vmem:[#allocation15_spill] sm:$0xff] %v1236_v0  ;;  %v119_v6 = vsel %vm1916_vm1, %v1236_v0, 0.0  ;;  %v116_v7 = vsel %vm1916_vm1, %v1238_v1, 0.0  ;;  %v79_v11 = vsel %vm65_vm15, 1.0, %v1904_v15 }
  0x19   :  { %1946 = vst [vmem:[#allocation16_spill] sm:$0xff] %v1238_v1  ;;  %v113_v8 = vsel %vm1916_vm1, %v1240_v2, 0.0  ;;  %v1265_v13 = vadd.f32 %v79_v11, %v51_v4  ;;  %v107_v16 = vsel %vm1916_vm1, %v1263_v12, 0.0 }
  0x1a   :  { %1947 = vst [vmem:[#allocation17_spill] sm:$0xff] %v1240_v2 }
  0x1b   :  { %1948 = vst [vmem:[#allocation18_spill] sm:$0xff] %v1263_v12  ;;  %v110_v17 = vsel %vm1916_vm1, %v1265_v13, 0.0 }
  0x1c   :  { %1949 = vst [vmem:[#allocation19_spill] sm:$0xff] %v1265_v13 }
  0x1d   :  { %930 = vmatmul.msk.f32.gmra.mxu0 %vm333_vm0, %v320_v53 }
  0x1e   :  { %129 = vadd.xlane.f32.xlu0 %v128_v54  ;;  %126 = vadd.xlane.f32.xlu1 %v125_v55 }
  0x1f   :  { %123 = vadd.xlane.f32.xlu2 %v122_v56 }
  0x25   :  { %931 = vmatmul.msk.f32.gmra.mxu0 %vm333_vm0, %v321_v5 }
  0x26   :  { %120 = vadd.xlane.f32.xlu0 %v119_v6  ;;  %117 = vadd.xlane.f32.xlu1 %v116_v7 }
  0x27   :  { %114 = vadd.xlane.f32.xlu2 %v113_v8 }
  0x2d   :  { %932 = vmatmul.msk.f32.gmra.mxu0 %vm333_vm0, %v322_v14 }
  0x2e   :  { %108 = vadd.xlane.f32.xlu1 %v107_v16  ;;  %111 = vadd.xlane.f32.xlu0 %v110_v17 }
  0x35   :  { %933 = vmatmul.msk.f32.gmra.mxu0 %vm333_vm0, %v323_v18 }
  0x3d   :  { %934 = vmatmul.msk.f32.gmra.mxu0 %vm333_vm0, %v324_v19 }
  0x45   :  { %935 = vmatmul.msk.f32.gmra.mxu0 %vm333_vm0, %v325_v23 }
  0x4d   :  { %936 = vmatmul.msk.f32.gmra.mxu0 %vm333_vm0, %v326_v24 }
  0x55   :  { %937 = vmatmul.msk.f32.gmra.mxu0 %vm333_vm0, %v327_v25 }
  0x5d   :  { %938 = vmatmul.msk.f32.gmra.mxu0 %vm333_vm0, %v328_v26 }
  0x65   :  { %939 = vmatmul.msk.f32.gmra.mxu0 %vm333_vm0, %v329_v27 }
  0x6d   :  { %940 = vmatmul.msk.f32.gmra.mxu0 %vm333_vm0, %v330_v28 }
  0x80   :  { %v1307_v29 = vpop.f32.mrf.mxu0 }
  0x81   :  { %1950 = vst [vmem:[#allocation20_spill] sm:$0xff] %v1307_v29  ;;  %v1321_v39 = vpop.xlane.xlu0 %147  ;;  %v1323_v40 = vpop.xlane.xlu1 %141 }
  0x82   :  { %v1327_v42 = vpop.xlane.xlu2 %135  ;;  %992 = vrsqrt.f32 %v1321_v39  ;;  %vm299_vm0 = vweird.f32 %v1321_v39  ;;  %vm279_vm3 = vweird.f32 %v1323_v40  ;;  %vm162_vm12 = vcmp.gt.f32.partialorder %v1321_v39, 0.0 }
  0x83   :  { %994 = vrsqrt.f32 %v1323_v40  ;;  %vm259_vm6 = vweird.f32 %v1327_v42 }
  0x84   :  { %996 = vrsqrt.f32 %v1327_v42 }
  0x88   :  { %v1349_v53 = vpop.eup %992 }
  0x89   :  { %v1329_v43 = vpop.xlane.xlu0 %144  ;;  %v1331_v44 = vpop.xlane.xlu1 %138  ;;  %v294_v60 = vmul.f32 %v1349_v53, %v1321_v39  ;;  %vm300_vm2 = vweird.f32 %v1349_v53 }
  0x8a   :  { %v1309_v30 = vpop.f32.mrf.mxu0  ;;  %v1335_v46 = vpop.xlane.xlu2 %132  ;;  %998 = vrsqrt.f32 %v1329_v43  ;;  %vm289_vm5 = vweird.f32 %v1329_v43  ;;  %vm269_vm8 = vweird.f32 %v1331_v44  ;;  %vm1442_vm13 = vmor %vm299_vm0, %vm300_vm2 }
  0x8b   :  { %1000 = vrsqrt.f32 %v1335_v46  ;;  %v1351_v54 = vpop.eup %994  ;;  %v295_v10 = vmul.f32 %v1349_v53, %v294_v60  ;;  %vm249_vm9 = vweird.f32 %v1335_v46  ;;  %vm157_vm2 = vcmp.gt.f32.partialorder %v1335_v46, 0.0 }
  0x8c   :  { %1002 = vrsqrt.f32 %v1331_v44  ;;  %v1355_v56 = vpop.eup %996  ;;  %v274_v5 = vmul.f32 %v1351_v54, %v1323_v40  ;;  %vm280_vm4 = vweird.f32 %v1351_v54 }
  0x8d   :  { %v254_v7 = vmul.f32 %v1355_v56, %v1327_v42  ;;  %v296_v25 = vmul.f32 0.5, %v295_v10  ;;  %vm260_vm7 = vweird.f32 %v1355_v56  ;;  %vm1476_vm1 = vmor %vm279_vm3, %vm280_vm4 }
  0x8e   :  { %v275_v14 = vmul.f32 %v1351_v54, %v274_v5 }
  0x8f   :  { %v255_v17 = vmul.f32 %v1355_v56, %v254_v7  ;;  %v297_v3 = vsub.f32 1.5, %v296_v25 }
  0x90   :  { %v1358_v57 = vpop.eup %998  ;;  %v276_v5 = vmul.f32 0.5, %v275_v14 }
  0x91   :  { %v1338_v47 = vpop.xlane.xlu0 %129  ;;  %v1341_v48 = vpop.xlane.xlu1 %126  ;;  %v284_v6 = vmul.f32 %v1358_v57, %v1329_v43  ;;  %vm290_vm10 = vweird.f32 %v1358_v57 }
  0x92   :  { %v1311_v31 = vpop.f32.mrf.mxu0  ;;  %v1353_v55 = vpop.xlane.xlu2 %123  ;;  %1004 = vrsqrt.f32 %v1338_v47  ;;  %v277_v25 = vsub.f32 1.5, %v276_v5  ;;  %v298_v5 = vmul.f32 %v1349_v53, %v297_v3  ;;  %vm1460_vm0 = vmor %vm289_vm5, %vm290_vm10  ;;  %vm156_vm4 = vcmp.gt.f32.partialorder %v1338_v47, 0.0 }
  0x93   :  { %v1362_v59 = vpop.eup %1000  ;;  %1006 = vrsqrt.f32 %v1341_v48  ;;  %v285_v16 = vmul.f32 %v1358_v57, %v284_v6  ;;  %vm219_vm5 = vweird.f32 %v1353_v55 }
  0x94   :  { %v1369_v62 = vpop.eup %1002  ;;  %v244_v8 = vmul.f32 %v1362_v59, %v1335_v46  ;;  %1008 = vrsqrt.f32 %v1353_v55  ;;  %vm250_vm14 = vweird.f32 %v1362_v59  ;;  %v302_v52 = vsel %vm1442_vm13, %v1349_v53, %v298_v5 }
  0x95   :  { %v264_v4 = vmul.f32 %v1369_v62, %v1331_v44  ;;  %v286_v6 = vmul.f32 0.5, %v285_v16  ;;  %vm270_vm11 = vweird.f32 %v1369_v62  ;;  %vm161_vm13 = vcmp.gt.f32.partialorder %v1329_v43, 0.0 }
  0x96   :  { %v245_v18 = vmul.f32 %v1362_v59, %v244_v8  ;;  %v256_v8 = vmul.f32 0.5, %v255_v17  ;;  %vm1493_vm3 = vmor %vm269_vm8, %vm270_vm11  ;;  %vm159_vm11 = vcmp.gt.f32.partialorder %v1331_v44, 0.0 }
  0x97   :  { %v265_v26 = vmul.f32 %v1369_v62, %v264_v4  ;;  %v287_v20 = vsub.f32 1.5, %v286_v6  ;;  %vm1510_vm8 = vmor %vm259_vm6, %vm260_vm7  ;;  %vm155_vm7 = vcmp.gt.f32.partialorder %v1341_v48, 0.0 }
  0x98   :  { %v1382_v9 = vpop.eup %1004  ;;  %v246_v10 = vmul.f32 0.5, %v245_v18  ;;  %vm1526_vm6 = vmor %vm249_vm9, %vm250_vm14  ;;  %vm158_vm9 = vcmp.gt.f32.partialorder %v1327_v42, 0.0 }
  0x99   :  { %v1367_v61 = vpop.xlane.xlu0 %120  ;;  %v1371_v63 = vpop.xlane.xlu1 %117  ;;  %v234_v19 = vmul.f32 %v1382_v9, %v1338_v47  ;;  %v266_v14 = vmul.f32 0.5, %v265_v26  ;;  %v257_v26 = vsub.f32 1.5, %v256_v8  ;;  %vm240_vm15 = vweird.f32 %v1382_v9 }
  0x9a   :  { %v1313_v32 = vpop.f32.mrf.mxu0  ;;  %1010 = vrsqrt.f32 %v1367_v61  ;;  %v1388_v11 = vpop.eup %1006  ;;  %v288_v3 = vmul.f32 %v1358_v57, %v287_v20 }
  0x9b   :  { %v1396_v23 = vpop.xlane.xlu2 %114  ;;  %1012 = vrsqrt.f32 %v1371_v63  ;;  %v1402_v27 = vpop.eup %1008  ;;  %v224_v28 = vmul.f32 %v1388_v11, %v1341_v48  ;;  %v235_v4 = vmul.f32 %v1382_v9, %v234_v19  ;;  %v267_v22 = vsub.f32 1.5, %v266_v14 }
  0x9c   :  { %1014 = vrsqrt.f32 %v1396_v23  ;;  %v214_v17 = vmul.f32 %v1402_v27, %v1353_v55  ;;  %vm220_vm10 = vweird.f32 %v1402_v27  ;;  %v258_v53 = vmul.f32 %v1355_v56, %v257_v26 }
  0x9d   :  { %v225_v16 = vmul.f32 %v1388_v11, %v224_v28  ;;  %v247_v28 = vsub.f32 1.5, %v246_v10  ;;  %v236_v33 = vmul.f32 0.5, %v235_v4  ;;  %v292_v5 = vsel %vm1460_vm0, %v1358_v57, %v288_v3 }
  0x9e   :  { %v215_v10 = vmul.f32 %v1402_v27, %v214_v17  ;;  %vm160_vm0 = vcmp.gt.f32.partialorder %v1323_v40, 0.0  ;;  %v1542_v12 = vsel %vm161_vm13, %v292_v5, 0.0  ;;  %v262_v0 = vsel %vm1510_vm8, %v1355_v56, %v258_v53 }
  0x9f   :  { %v226_v8 = vmul.f32 0.5, %v225_v16  ;;  %v237_v17 = vsub.f32 1.5, %v236_v33  ;;  %v1468_v50 = vmul.f32 %v1362_v59, %v247_v28  ;;  %v268_v33 = vmul.f32 %v1369_v62, %v267_v22 }
  0xa0   :  { %v1409_v60 = vpop.eup %1010  ;;  %v278_v28 = vmul.f32 %v1351_v54, %v277_v25  ;;  %v216_v2 = vmul.f32 0.5, %v215_v10  ;;  %vm1966_vm14 = vweird.f32 %v1388_v11  ;;  %vm209_vm13 = vweird.f32 %v1367_v61 }
  0xa1   :  { %v1413_v7 = vpop.xlane.xlu0 %111  ;;  %v1417_v15 = vpop.xlane.xlu1 %108  ;;  %v204_v18 = vmul.f32 %v1409_v60, %v1367_v61  ;;  %v227_v1 = vsub.f32 1.5, %v226_v8  ;;  %vm210_vm8 = vweird.f32 %v1409_v60 }
  0xa2   :  { %v1315_v36 = vpop.f32.mrf.mxu0  ;;  %1016 = vrsqrt.f32 %v1413_v7  ;;  %v1428_v19 = vpop.eup %1012  ;;  %v217_v3 = vsub.f32 1.5, %v216_v2  ;;  %v1989_v2 = vld [vmem:[#allocation15_spill] sm:$0xff] }
  0xa3   :  { %1018 = vrsqrt.f32 %v1417_v15  ;;  %v1433_v34 = vpop.eup %1014  ;;  %v205_v4 = vmul.f32 %v1409_v60, %v204_v18  ;;  %v194_v14 = vmul.f32 %v1428_v19, %v1371_v63 }
  0xa4   :  { %v184_v18 = vmul.f32 %v1433_v34, %v1396_v23 }
  0xa5   :  { %v206_v13 = vmul.f32 0.5, %v205_v4  ;;  %v195_v22 = vmul.f32 %v1428_v19, %v194_v14  ;;  %v1520_v4 = vsel %vm162_vm12, %v302_v52, 0.0  ;;  %v272_v14 = vsel %vm1493_vm3, %v1369_v62, %v268_v33 }
  0xa6   :  { %v185_v8 = vmul.f32 %v1433_v34, %v184_v18  ;;  %v282_v52 = vsel %vm1476_vm1, %v1351_v54, %v278_v28  ;;  %v238_v18 = vmul.f32 %v1382_v9, %v237_v17  ;;  %vm1963_vm1 = vweird.f32 %v1338_v47 }
  0xa7   :  { %v196_v16 = vmul.f32 0.5, %v195_v22  ;;  %vm1554_vm12 = vmor %vm1963_vm1, %vm240_vm15  ;;  %v252_v54 = vsel %vm1526_vm6, %v1362_v59, %v1468_v50  ;;  %v1564_v56 = vsel %vm159_vm11, %v272_v14, 0.0  ;;  %v207_v62 = vsub.f32 1.5, %v206_v13  ;;  %v2005_v50 = vld [vmem:[#allocation9_spill] sm:$0xff]  ;;  %v1763_v22 = vld [vmem:[%s1898_s4] ss:$0 sm:$0xff] }
  0xa8   :  { %v1454_v35 = vpop.eup %1016  ;;  %v186_v43 = vmul.f32 0.5, %v185_v8  ;;  %v228_v33 = vmul.f32 %v1388_v11, %v227_v1  ;;  %vm1967_vm15 = vweird.f32 %v1341_v48  ;;  %v218_v13 = vmul.f32 %v1402_v27, %v217_v3  ;;  %vm1598_vm11 = vmor %vm219_vm5, %vm220_vm10 }
  0xa9   :  { %v1470_v20 = vpop.eup %1018  ;;  %v174_v25 = vmul.f32 %v1454_v35, %v1413_v7  ;;  %vm1578_vm3 = vmor %vm1967_vm15, %vm1966_vm14  ;;  %v1587_v1 = vsel %vm158_vm9, %v262_v0, 0.0  ;;  %v197_v40 = vsub.f32 1.5, %v196_v16  ;;  %v242_v59 = vsel %vm1554_vm12, %v1382_v9, %v238_v18 }
  0xaa   :  { %v1317_v37 = vpop.f32.mrf.mxu0  ;;  %v164_v10 = vmul.f32 %v1470_v20, %v1417_v15  ;;  %vm199_vm6 = vweird.f32 %v1371_v63  ;;  %v1606_v42 = vsel %vm157_vm2, %v252_v54, 0.0  ;;  %vm1618_vm5 = vmor %vm209_vm13, %vm210_vm8  ;;  %vm189_vm2 = vweird.f32 %v1396_v23  ;;  %v1995_v54 = vld [vmem:[#allocation12_spill] sm:$0xff] }
  0xab   :  { %v175_v29 = vmul.f32 %v1454_v35, %v174_v25  ;;  %v232_v25 = vsel %vm1578_vm3, %v1388_v11, %v228_v33  ;;  %vm190_vm10 = vweird.f32 %v1433_v34  ;;  %vm154_vm9 = vcmp.gt.f32.partialorder %v1353_v55, 0.0  ;;  %v2001_v33 = vld [vmem:[#allocation10_spill] sm:$0xff] }
  0xac   :  { %v165_v17 = vmul.f32 %v1470_v20, %v164_v10  ;;  %v1627_v46 = vsel %vm156_vm4, %v242_v59, 0.0  ;;  %v222_v6 = vsel %vm1598_vm11, %v1402_v27, %v218_v13  ;;  %vm179_vm4 = vweird.f32 %v1413_v7  ;;  %vm1660_vm15 = vmor %vm189_vm2, %vm190_vm10  ;;  %v598_v13 = vld [vmem:[%s1899_s5 + $0x18] sm:$0xff]  ;;  %v595_v59 = vld [vmem:[%s1899_s5] sm:$0xff] }
  0xad   :  { %v176_v44 = vmul.f32 0.5, %v175_v29  ;;  %v187_v29 = vsub.f32 1.5, %v186_v43  ;;  %vm153_vm12 = vcmp.gt.f32.partialorder %v1367_v61, 0.0  ;;  %v1648_v27 = vsel %vm155_vm7, %v232_v25, 0.0  ;;  %v1993_v43 = vld [vmem:[#allocation13_spill] sm:$0xff]  ;;  %655 = vmatpush.msra.mxu2 %v598_v13 }
  0xae   :  { %v166_v9 = vmul.f32 0.5, %v165_v17  ;;  %vm180_vm14 = vweird.f32 %v1454_v35  ;;  %vm152_vm7 = vcmp.gt.f32.partialorder %v1371_v63, 0.0  ;;  %vm169_vm3 = vweird.f32 %v1417_v15  ;;  %v1999_v17 = vld [vmem:[#allocation8_spill] sm:$0xff] }
  0xaf   :  { %v177_v11 = vsub.f32 1.5, %v176_v44  ;;  %v188_v47 = vmul.f32 %v1433_v34, %v187_v29  ;;  %v1668_v48 = vsel %vm154_vm9, %v222_v6, 0.0  ;;  %vm170_vm13 = vweird.f32 %v1470_v20  ;;  %vm1679_vm8 = vmor %vm179_vm4, %vm180_vm14  ;;  %v596_v44 = vld [vmem:[%s1899_s5 + $0x8] sm:$0xff] }
  0xb0   :  { %vm151_vm11 = vcmp.gt.f32.partialorder %v1396_v23, 0.0  ;;  %vm1982_vm2 = vcmask 916480  }
  0xb1   :  { %vm1984_vm10 = vmmov %vm1982_vm2 }
  0xb2   :  { %v1319_v38 = vpop.f32.mrf.mxu0  ;;  %vm1986_vm9 = vmmov %vm1982_vm2 }
  0xba   :  { %v1325_v41 = vpop.f32.mrf.mxu0 }
  0xbb   :  { %v442_v57 = vmul.f32 %v1325_v41, %v1627_v46 }
  0xc2   :  { %v1333_v45 = vpop.f32.mrf.mxu0 }
  0xc3   :  { %v443_v8 = vmul.f32 %v1333_v45, %v1606_v42  ;;  %v167_v45 = vsub.f32 1.5, %v166_v9 }
  0xca   :  { %v1343_v49 = vpop.f32.mrf.mxu0 }
  0xcb   :  { %v444_v53 = vmul.f32 %v1343_v49, %v1587_v1  ;;  %v198_v49 = vmul.f32 %v1428_v19, %v197_v40  ;;  %v597_v40 = vld [vmem:[%s1899_s5 + $0x10] sm:$0xff] }
  0xcc   :  { %656 = vmatpush.msra.mxu2 %v597_v40 }
  0xce   :  { %657 = vmatpush.msra.mxu2 %v596_v44 }
  0xd0   :  { %658 = vmatpush.msra.mxu2 %v595_v59 }
  0xd2   :  { %v1360_v58 = vpop.f32.mrf.mxu0 }
  0xda   :  { %v1398_v24 = vpop.f32.mrf.mxu0 }
  0xe2   :  { %v429_v21 = vpop.f32.mrf.mxu0 }
  0xe3   :  { %v447_v51 = vmul.f32 %v429_v21, %v1542_v12  ;;  %v1568_v21 = vsel %vm160_vm0, %v282_v52, 0.0  ;;  %vm200_vm0 = vweird.f32 %v1428_v19  ;;  %v441_v52 = vmul.f32 %v1319_v38, %v1648_v27 }
  0xe4   :  { %v446_v28 = vmul.f32 %v1398_v24, %v1568_v21  ;;  %v445_v24 = vmul.f32 %v1360_v58, %v1564_v56  ;;  %v208_v58 = vmul.f32 %v1409_v60, %v207_v62  ;;  %vm1639_vm1 = vmor %vm199_vm6, %vm200_vm0  ;;  %v192_v38 = vsel %vm1660_vm15, %v1433_v34, %v188_v47  ;;  %v1997_v62 = vld [vmem:[#allocation11_spill] sm:$0xff] }
  0xe5   :  { %v202_v41 = vsel %vm1639_vm1, %v1428_v19, %v198_v49  ;;  %v168_v19 = vmul.f32 %v1470_v20, %v167_v45  ;;  %vm171_vm6 = vmor %vm169_vm3, %vm170_vm13  ;;  %vm150_vm0 = vcmp.gt.f32.partialorder %v1413_v7, 0.0  ;;  %v1704_v23 = vsel %vm151_vm11, %v192_v38, 0.0 }
  0xe6   :  { %v1694_v3 = vsel %vm152_vm7, %v202_v41, 0.0  ;;  %vm1988_vm1 = vmmov %vm1982_vm2 }
  0xe7   :  { %v438_v34 = vmul.f32 %v1313_v32, %v1694_v3  ;;  %v172_v16 = vsel %vm171_vm6, %v1470_v20, %v168_v19  ;;  %v1980_v32 = vld [vmem:[#allocation20_spill] sm:$0xff]  ;;  %v1983_v20 = vld [vmem:[#allocation19_spill] sm:$0xff]  ;;  %vm1990_vm4 = vmmov %vm1988_vm1 }
  0xe8   :  { %vm1994_vm14 = vmmov %vm1988_vm1 }
  0xe9   :  { %vm1996_vm15 = vmmov %vm1988_vm1 }
  0xea   :  { %v432_v26 = vpop.f32.mrf.mxu0  ;;  %vm1998_vm7 = vmmov %vm1988_vm1 }
  0xeb   :  { %v448_v39 = vmul.f32 %v432_v26, %v1520_v4  ;;  %v212_v26 = vsel %vm1618_vm5, %v1409_v60, %v208_v58  ;;  %v178_v60 = vmul.f32 %v1454_v35, %v177_v11  ;;  %vm149_vm5 = vcmp.gt.f32.partialorder %v1417_v15, 0.0  ;;  %v1981_v15 = vld [vmem:[#allocation18_spill] sm:$0xff]  ;;  %vm2000_vm3 = vmmov %vm1988_vm1 }
  0xec   :  { %v1685_v55 = vsel %vm153_vm12, %v212_v26, 0.0  ;;  %v1714_v7 = vsel %vm149_vm5, %v172_v16, 0.0  ;;  %vm1992_vm12 = vmmov %vm1988_vm1 }
  0xed   :  { %493 = vmatpush.msra.mxu1 %v448_v39  ;;  %v440_v39 = vmul.f32 %v1317_v37, %v1668_v48  ;;  %v439_v61 = vmul.f32 %v1315_v36, %v1685_v55  ;;  %v182_v37 = vsel %vm1679_vm8, %v1454_v35, %v178_v60  ;;  %v437_v36 = vmul.f32 %v1311_v31, %v1704_v23  ;;  %v1987_v31 = vld [vmem:[#allocation16_spill] sm:$0xff]  ;;  %vm2002_vm13 = vmmov %vm1988_vm1 }
  0xee   :  { %v1710_v18 = vsel %vm150_vm0, %v182_v37, 0.0  ;;  %v435_v0 = vmul.f32 %v1980_v32, %v1714_v7  ;;  %vm2004_vm8 = vmmov %vm1988_vm1  ;;  %vm600_vm0 = vcmask 261120  }
  0xef   :  { %494 = vmatpush.msra.mxu1 %v447_v51  ;;  %v436_v35 = vmul.f32 %v1309_v30, %v1710_v18  ;;  %v1985_v51 = vld [vmem:[#allocation17_spill] sm:$0xff]  ;;  %v1991_v30 = vld [vmem:[#allocation14_spill] sm:$0xff]  ;;  %vm2006_vm11 = vmmov %vm1988_vm1 }
  0xf0   :  { %vm2008_vm6 = vmmov %vm1988_vm1 }
  0xf1   :  { %495 = vmatpush.msra.mxu1 %v446_v28  ;;  %v2003_v28 = vld [vmem:[#allocation7_spill] sm:$0xff]  ;;  %vm2009_vm5 = vmmov %vm1988_vm1 }
  0xf3   :  { %496 = vmatpush.msra.mxu1 %v445_v24  ;;  %v2007_v24 = vld [vmem:[#allocation6_spill] sm:$0xff] }
  0xf5   :  { %497 = vmatpush.msra.mxu1 %v444_v53 }
  0xf7   :  { %498 = vmatpush.msra.mxu1 %v443_v8 }
  0xf9   :  { %499 = vmatpush.msra.mxu1 %v442_v57 }
  0xfb   :  { %500 = vmatpush.msra.mxu1 %v441_v52 }
  0xfd   :  { %501 = vmatpush.msra.mxu1 %v440_v39 }
  0xff   :  { %502 = vmatpush.msra.mxu1 %v439_v61 }
 0x101   :  { %503 = vmatpush.msra.mxu1 %v438_v34 }
 0x103   :  { %504 = vmatpush.msra.mxu1 %v437_v36 }
 0x105   :  { %505 = vmatpush.msra.mxu1 %v436_v35 }
 0x107   :  { %506 = vmatpush.msra.mxu1 %v435_v0 }
 0x108   :  { %941 = vmatmul.msk.f32.vlgmr.msra.gmra.mxu1 %vm1982_vm2, %v1981_v15  ;;  %vm2010_vm2 = vmmov %vm1988_vm1 }
 0x110   :  { %942 = vmatmul.msk.f32.gmra.mxu1 %vm1984_vm10, %v1983_v20  ;;  %vm2011_vm10 = vmmov %vm1988_vm1 }
 0x118   :  { %943 = vmatmul.msk.f32.gmra.mxu1 %vm1986_vm9, %v1985_v51  ;;  %vm2012_vm9 = vmmov %vm1988_vm1 }
 0x120   :  { %944 = vmatmul.msk.f32.gmra.mxu1 %vm1988_vm1, %v1987_v31 }
 0x128   :  { %945 = vmatmul.msk.f32.gmra.mxu1 %vm1990_vm4, %v1989_v2  ;;  %vm2013_vm4 = vmmov %vm1988_vm1 }
 0x130   :  { %946 = vmatmul.msk.f32.gmra.mxu1 %vm1992_vm12, %v1991_v30  ;;  %vm2014_vm12 = vmmov %vm1988_vm1 }
 0x138   :  { %947 = vmatmul.msk.f32.gmra.mxu1 %vm1994_vm14, %v1993_v43  ;;  %vm2015_vm14 = vmmov %vm1988_vm1 }
 0x140   :  { %948 = vmatmul.msk.f32.gmra.mxu1 %vm1996_vm15, %v1995_v54  ;;  %vm2016_vm15 = vmmov %vm1988_vm1 }
 0x148   :  { %949 = vmatmul.msk.f32.gmra.mxu1 %vm1998_vm7, %v1997_v62  ;;  %vm2017_vm7 = vmmov %vm1988_vm1 }
 0x150   :  { %950 = vmatmul.msk.f32.gmra.mxu1 %vm2000_vm3, %v1999_v17  ;;  %vm2018_vm3 = vmmov %vm1988_vm1 }
 0x158   :  { %951 = vmatmul.msk.f32.gmra.mxu1 %vm2002_vm13, %v2001_v33  ;;  %vm2019_vm13 = vmmov %vm1988_vm1 }
 0x160   :  { %952 = vmatmul.msk.f32.gmra.mxu1 %vm2004_vm8, %v2003_v28  ;;  %vm2020_vm8 = vmmov %vm1988_vm1 }
 0x168   :  { %953 = vmatmul.msk.f32.gmra.mxu1 %vm2006_vm11, %v2005_v50  ;;  %vm2021_vm11 = vmmov %vm1988_vm1 }
 0x170   :  { %954 = vmatmul.msk.f32.gmra.mxu1 %vm2008_vm6, %v2007_v24 }
 0x185   :  { %v508_v29 = vpop.f32.mrf.mxu1 }
 0x186   :  { %v550_v9 = vmul.f32 %v508_v29, %v1714_v7 }
 0x188   :  { %v567_v58 = vadd.f32 %v1763_v22, %v550_v9 }
 0x18a   :  { %v581_v25 = vmax.f32 %v567_v58, 0.0 }
 0x18c   :  { %955 = vmatmul.msk.f32.vlgmr.msra.gmra.mxu2 %vm600_vm0, %v581_v25 }
 0x18d   :  { %v511_v53 = vpop.f32.mrf.mxu1 }
 0x18e   :  { %v551_v5 = vmul.f32 %v511_v53, %v1710_v18 }
 0x190   :  { %v568_v49 = vadd.f32 %v1763_v22, %v551_v5 }
 0x192   :  { %v582_v11 = vmax.f32 %v568_v49, 0.0 }
 0x194   :  { %956 = vmatmul.msk.f32.gmra.mxu2 %vm600_vm0, %v582_v11 }
 0x195   :  { %v514_v6 = vpop.f32.mrf.mxu1 }
 0x196   :  { %v552_v8 = vmul.f32 %v514_v6, %v1704_v23 }
 0x198   :  { %v569_v10 = vadd.f32 %v1763_v22, %v552_v8 }
 0x19a   :  { %v583_v47 = vmax.f32 %v569_v10, 0.0 }
 0x19c   :  { %957 = vmatmul.msk.f32.gmra.mxu2 %vm600_vm0, %v583_v47 }
 0x19d   :  { %v517_v45 = vpop.f32.mrf.mxu1 }
 0x19e   :  { %v553_v26 = vmul.f32 %v517_v45, %v1694_v3 }
 0x1a0   :  { %v570_v57 = vadd.f32 %v1763_v22, %v553_v26 }
 0x1a2   :  { %v584_v14 = vmax.f32 %v570_v57, 0.0 }
 0x1a4   :  { %958 = vmatmul.msk.f32.gmra.mxu2 %vm600_vm0, %v584_v14 }
 0x1a5   :  { %v520_v41 = vpop.f32.mrf.mxu1 }
 0x1a6   :  { %v554_v60 = vmul.f32 %v520_v41, %v1685_v55 }
 0x1a8   :  { %v571_v52 = vadd.f32 %v1763_v22, %v554_v60 }
 0x1aa   :  { %v585_v63 = vmax.f32 %v571_v52, 0.0 }
 0x1ac   :  { %959 = vmatmul.msk.f32.gmra.mxu2 %vm600_vm0, %v585_v63 }
 0x1ad   :  { %v523_v19 = vpop.f32.mrf.mxu1 }
 0x1ae   :  { %v555_v39 = vmul.f32 %v523_v19, %v1668_v48 }
 0x1b0   :  { %v572_v38 = vadd.f32 %v1763_v22, %v555_v39 }
 0x1b2   :  { %v586_v61 = vmax.f32 %v572_v38, 0.0 }
 0x1b4   :  { %960 = vmatmul.msk.f32.gmra.mxu2 %vm600_vm0, %v586_v61 }
 0x1b5   :  { %v526_v37 = vpop.f32.mrf.mxu1 }
 0x1b6   :  { %v556_v34 = vmul.f32 %v526_v37, %v1648_v27 }
 0x1b8   :  { %v573_v16 = vadd.f32 %v1763_v22, %v556_v34 }
 0x1ba   :  { %v587_v36 = vmax.f32 %v573_v16, 0.0 }
 0x1bc   :  { %961 = vmatmul.msk.f32.gmra.mxu2 %vm600_vm0, %v587_v36 }
 0x1bd   :  { %v529_v35 = vpop.f32.mrf.mxu1 }
 0x1be   :  { %v557_v32 = vmul.f32 %v529_v35, %v1627_v46 }
 0x1c0   :  { %v574_v0 = vadd.f32 %v1763_v22, %v557_v32 }
 0x1c2   :  { %v588_v13 = vmax.f32 %v574_v0, 0.0 }
 0x1c4   :  { %962 = vmatmul.msk.f32.gmra.mxu2 %vm600_vm0, %v588_v13 }
 0x1c5   :  { %v532_v40 = vpop.f32.mrf.mxu1 }
 0x1c6   :  { %v558_v44 = vmul.f32 %v532_v40, %v1606_v42 }
 0x1c8   :  { %v575_v59 = vadd.f32 %v1763_v22, %v558_v44 }
 0x1ca   :  { %v589_v29 = vmax.f32 %v575_v59, 0.0 }
 0x1cc   :  { %963 = vmatmul.msk.f32.gmra.mxu2 %vm600_vm0, %v589_v29 }
 0x1cd   :  { %v535_v9 = vpop.f32.mrf.mxu1 }
 0x1ce   :  { %v559_v58 = vmul.f32 %v535_v9, %v1587_v1 }
 0x1d0   :  { %v576_v25 = vadd.f32 %v1763_v22, %v559_v58 }
 0x1d2   :  { %v590_v53 = vmax.f32 %v576_v25, 0.0 }
 0x1d4   :  { %964 = vmatmul.msk.f32.gmra.mxu2 %vm600_vm0, %v590_v53 }
 0x1d5   :  { %v538_v5 = vpop.f32.mrf.mxu1 }
 0x1d6   :  { %v560_v49 = vmul.f32 %v538_v5, %v1564_v56 }
 0x1d8   :  { %v577_v11 = vadd.f32 %v1763_v22, %v560_v49 }
 0x1da   :  { %v591_v6 = vmax.f32 %v577_v11, 0.0 }
 0x1dc   :  { %965 = vmatmul.msk.f32.gmra.mxu2 %vm600_vm0, %v591_v6 }
 0x1dd   :  { %v541_v8 = vpop.f32.mrf.mxu1 }
 0x1de   :  { %v561_v10 = vmul.f32 %v541_v8, %v1568_v21 }
 0x1e0   :  { %v578_v47 = vadd.f32 %v1763_v22, %v561_v10 }
 0x1e2   :  { %v592_v45 = vmax.f32 %v578_v47, 0.0 }
 0x1e4   :  { %966 = vmatmul.msk.f32.gmra.mxu2 %vm600_vm0, %v592_v45 }
 0x1e5   :  { %v544_v26 = vpop.f32.mrf.mxu1 }
 0x1e6   :  { %v562_v57 = vmul.f32 %v544_v26, %v1542_v12  ;;  %v2022_v26 = vld [vmem:[#allocation5_spill] sm:$0xff] }
 0x1e8   :  { %v579_v14 = vadd.f32 %v1763_v22, %v562_v57 }
 0x1ea   :  { %v593_v41 = vmax.f32 %v579_v14, 0.0 }
 0x1ec   :  { %967 = vmatmul.msk.f32.gmra.mxu2 %vm600_vm0, %v593_v41 }
 0x1ed   :  { %v547_v60 = vpop.f32.mrf.mxu1 }
 0x1ee   :  { %v563_v52 = vmul.f32 %v547_v60, %v1520_v4 }
 0x1f0   :  { %v580_v63 = vadd.f32 %v1763_v22, %v563_v52  ;;  %v857_v52 = vld [vmem:[%s1901_s7 + $0x18] sm:$0xff] }
 0x1f1   :  { %877 = vmatpush.msrb.mxu2 %v857_v52 }
 0x1f2   :  { %v594_v19 = vmax.f32 %v580_v63, 0.0 }
 0x1f4   :  { %968 = vmatmul.msk.f32.gmra.mxu2 %vm600_vm0, %v594_v19 }
 0x20f   :  { %v660_v39 = vpop.f32.mrf.mxu2 }
 0x210   :  { %v702_v45 = vmul.f32 %v660_v39, %v1714_v7  ;;  %v989_v39 = vld [vmem:[%s1900_s6] ss:$0 sm:$0xff] }
 0x217   :  { %v663_v38 = vpop.f32.mrf.mxu2 }
 0x218   :  { %v703_v47 = vmul.f32 %v663_v38, %v1710_v18 }
 0x21f   :  { %v666_v61 = vpop.f32.mrf.mxu2 }
 0x220   :  { %v704_v10 = vmul.f32 %v666_v61, %v1704_v23 }
 0x227   :  { %v669_v37 = vpop.f32.mrf.mxu2 }
 0x228   :  { %v705_v8 = vmul.f32 %v669_v37, %v1694_v3 }
 0x22f   :  { %v672_v34 = vpop.f32.mrf.mxu2 }
 0x230   :  { %v706_v6 = vmul.f32 %v672_v34, %v1685_v55 }
 0x237   :  { %v675_v16 = vpop.f32.mrf.mxu2 }
 0x238   :  { %v707_v11 = vmul.f32 %v675_v16, %v1668_v48 }
 0x23f   :  { %v678_v36 = vpop.f32.mrf.mxu2 }
 0x240   :  { %v708_v49 = vmul.f32 %v678_v36, %v1648_v27 }
 0x247   :  { %v681_v35 = vpop.f32.mrf.mxu2 }
 0x248   :  { %v709_v5 = vmul.f32 %v681_v35, %v1627_v46 }
 0x24f   :  { %v684_v32 = vpop.f32.mrf.mxu2 }
 0x250   :  { %v710_v53 = vmul.f32 %v684_v32, %v1606_v42 }
 0x257   :  { %v687_v0 = vpop.f32.mrf.mxu2 }
 0x258   :  { %v711_v25 = vmul.f32 %v687_v0, %v1587_v1 }
 0x25f   :  { %v690_v13 = vpop.f32.mrf.mxu2 }
 0x260   :  { %v712_v58 = vmul.f32 %v690_v13, %v1564_v56 }
 0x267   :  { %v693_v40 = vpop.f32.mrf.mxu2 }
 0x268   :  { %v713_v9 = vmul.f32 %v693_v40, %v1568_v21 }
 0x26f   :  { %v696_v44 = vpop.f32.mrf.mxu2 }
 0x270   :  { %v714_v22 = vmul.f32 %v696_v44, %v1542_v12 }
 0x277   :  { %v699_v59 = vpop.f32.mrf.mxu2 }
 0x278   :  { %v715_v29 = vmul.f32 %v699_v59, %v1520_v4 }
 0x27a   :  { %718 = vmatpush.msra.mxu3 %v715_v29 }
 0x27c   :  { %719 = vmatpush.msra.mxu3 %v714_v22 }
 0x27e   :  { %720 = vmatpush.msra.mxu3 %v713_v9 }
 0x280   :  { %721 = vmatpush.msra.mxu3 %v712_v58  ;;  %v854_v58 = vld [vmem:[%s1901_s7] sm:$0xff] }
 0x282   :  { %722 = vmatpush.msra.mxu3 %v711_v25 }
 0x284   :  { %723 = vmatpush.msra.mxu3 %v710_v53 }
 0x286   :  { %724 = vmatpush.msra.mxu3 %v709_v5 }
 0x288   :  { %725 = vmatpush.msra.mxu3 %v708_v49 }
 0x28a   :  { %726 = vmatpush.msra.mxu3 %v707_v11 }
 0x28c   :  { %727 = vmatpush.msra.mxu3 %v706_v6 }
 0x28e   :  { %728 = vmatpush.msra.mxu3 %v705_v8 }
 0x290   :  { %729 = vmatpush.msra.mxu3 %v704_v10 }
 0x292   :  { %730 = vmatpush.msra.mxu3 %v703_v47 }
 0x294   :  { %731 = vmatpush.msra.mxu3 %v702_v45 }
 0x295   :  { %969 = vmatmul.msk.f32.vlgmr.msra.gmra.mxu3 %vm2009_vm5, %v1981_v15  ;;  %vm811_vm5 = vcmask 910336  }
 0x29d   :  { %970 = vmatmul.msk.f32.gmra.mxu3 %vm2010_vm2, %v1983_v20  ;;  %vm2024_vm2 = vmmov %vm1988_vm1 }
 0x2a5   :  { %971 = vmatmul.msk.f32.gmra.mxu3 %vm2011_vm10, %v1985_v51 }
 0x2ad   :  { %972 = vmatmul.msk.f32.gmra.mxu3 %vm2012_vm9, %v1987_v31 }
 0x2b5   :  { %973 = vmatmul.msk.f32.gmra.mxu3 %vm1988_vm1, %v1989_v2 }
 0x2bd   :  { %974 = vmatmul.msk.f32.gmra.mxu3 %vm2013_vm4, %v1991_v30 }
 0x2c5   :  { %975 = vmatmul.msk.f32.gmra.mxu3 %vm2014_vm12, %v1993_v43  ;;  %vm885_vm12 = vcmask 25600  }
 0x2cd   :  { %976 = vmatmul.msk.f32.gmra.mxu3 %vm2015_vm14, %v1995_v54 }
 0x2d5   :  { %977 = vmatmul.msk.f32.gmra.mxu3 %vm2016_vm15, %v1997_v62 }
 0x2dd   :  { %978 = vmatmul.msk.f32.gmra.mxu3 %vm2017_vm7, %v1999_v17 }
 0x2e5   :  { %979 = vmatmul.msk.f32.gmra.mxu3 %vm2018_vm3, %v2001_v33 }
 0x2ed   :  { %980 = vmatmul.msk.f32.gmra.mxu3 %vm2019_vm13, %v2003_v28  ;;  %v990_v28 = vld [vmem:[%s1895_s1] ss:$0 sm:$0xff] }
 0x2ee   :  { %vm808_vm6 = vcmp.eq.s32.totalorder %v990_v28, %v2022_v26 }
 0x2f5   :  { %981 = vmatmul.msk.f32.gmra.mxu3 %vm2020_vm8, %v2005_v50  ;;  %v2023_v50 = vmov 0.0  }
 0x2f6   :  { %v983_v57 = vsel %vm808_vm6, 1.0, %v2023_v50 }
 0x2fd   :  { %982 = vmatmul.msk.f32.gmra.mxu3 %vm2021_vm11, %v2007_v24  ;;  %v812_v24 = vsel %vm811_vm5, %v983_v57, 0.0 }
 0x2fe   :  { %813 = vadd.xlane.f32.xlu2 %v812_v24 }
 0x318   :  { %v733_v15 = vpop.f32.mrf.mxu3 }
 0x320   :  { %v736_v20 = vpop.f32.mrf.mxu3 }
 0x328   :  { %v739_v51 = vpop.f32.mrf.mxu3 }
 0x330   :  { %v742_v31 = vpop.f32.mrf.mxu3 }
 0x338   :  { %v745_v2 = vpop.f32.mrf.mxu3 }
 0x340   :  { %v748_v30 = vpop.f32.mrf.mxu3 }
 0x348   :  { %v751_v43 = vpop.f32.mrf.mxu3 }
 0x349   :  { %v781_v0 = vmul.f32 %v751_v43, %v1648_v27  ;;  %v776_v27 = vmul.f32 %v736_v20, %v1710_v18 }
 0x34b   :  { %v798_v40 = vadd.f32 %v989_v39, %v781_v0 }
 0x350   :  { %v754_v54 = vpop.f32.mrf.mxu3 }
 0x351   :  { %v782_v35 = vmul.f32 %v754_v54, %v1627_v46  ;;  %v777_v46 = vmul.f32 %v739_v51, %v1704_v23  ;;  %v991_v51 = vld [vmem:[%s1902_s8] ss:$0 sm:$0xff]  ;;  %s1053_s8 = smov [#allocation2]  }
 0x352   :  { %s916_s16 = sshll.u32 %s1053_s8, 4  ;;  %s917_s16 = int_to_ptr.vmem [resolvable:$true] %s916_s16 }
 0x353   :  { %v799_v13 = vadd.f32 %v989_v39, %v782_v35  ;;  %v794_v22 = vadd.f32 %v989_v39, %v777_v46 }
 0x358   :  { %v757_v62 = vpop.f32.mrf.mxu3 }
 0x360   :  { %v760_v17 = vpop.f32.mrf.mxu3 }
 0x361   :  { %v784_v16 = vmul.f32 %v760_v17, %v1587_v1  ;;  %v779_v1 = vmul.f32 %v745_v2, %v1685_v55  ;;  %v793_v55 = vadd.f32 %v989_v39, %v776_v27 }
 0x363   :  { %v801_v32 = vadd.f32 %v989_v39, %v784_v16  ;;  %v796_v59 = vadd.f32 %v989_v39, %v779_v1 }
 0x368   :  { %v763_v33 = vpop.f32.mrf.mxu3 }
 0x369   :  { %v785_v37 = vmul.f32 %v763_v33, %v1564_v56  ;;  %v780_v56 = vmul.f32 %v748_v30, %v1668_v48  ;;  %v775_v48 = vmul.f32 %v733_v15, %v1714_v7  ;;  %v855_v7 = vld [vmem:[%s1901_s7 + $0x8] sm:$0xff] }
 0x36b   :  { %v797_v44 = vadd.f32 %v989_v39, %v780_v56  ;;  %v792_v9 = vadd.f32 %v989_v39, %v775_v48 }
 0x370   :  { %v766_v14 = vpop.f32.mrf.mxu3 }
 0x371   :  { %v786_v38 = vmul.f32 %v766_v14, %v1568_v21  ;;  %v814_v23 = vpop.xlane.xlu2 %813 }
 0x372   :  { %v815_v18 = vmax.f32 %v814_v23, 1.0 }
 0x373   :  { %v803_v36 = vadd.f32 %v989_v39, %v786_v38 }
 0x374   :  { %1020 = vrcp.f32 %v815_v18  ;;  %vm844_vm10 = vweird.f32 %v815_v18  ;;  %v850_v11 = vand.u32 2147483648, %v815_v18  ;;  %v848_v8 = vand.u32 2147483647, %v815_v18 }
 0x376   :  { %v851_v10 = vor.u32 1.1754944e-38, %v850_v11  ;;  %vm849_vm4 = vcmp.eq.f32.partialorder %v848_v8, 8.507059e+37 }
 0x378   :  { %v769_v41 = vpop.f32.mrf.mxu3 }
 0x379   :  { %v787_v63 = vmul.f32 %v769_v41, %v1542_v12  ;;  %v783_v12 = vmul.f32 %v757_v62, %v1606_v42  ;;  %v778_v42 = vmul.f32 %v742_v31, %v1694_v3  ;;  %v856_v3 = vld [vmem:[%s1901_s7 + $0x10] sm:$0xff] }
 0x37a   :  { %878 = vmatpush.msrb.mxu2 %v856_v3  ;;  %v1021_v25 = vpop.eup %1020 }
 0x37b   :  { %v804_v34 = vadd.f32 %v989_v39, %v787_v63  ;;  %v800_v21 = vadd.f32 %v989_v39, %v783_v12  ;;  %v795_v29 = vadd.f32 %v989_v39, %v778_v42  ;;  %v840_v53 = vmul.f32 %v1021_v25, %v815_v18 }
 0x37c   :  { %879 = vmatpush.msrb.mxu2 %v855_v7  ;;  %vm845_vm9 = vweird.f32 %v1021_v25 }
 0x37d   :  { %v841_v5 = vsub.f32 1.0, %v840_v53  ;;  %vm846_vm1 = vmor %vm844_vm10, %vm845_vm9 }
 0x37e   :  { %880 = vmatpush.msrb.mxu2 %v854_v58 }
 0x37f   :  { %v842_v49 = vmul.f32 %v1021_v25, %v841_v5 }
 0x380   :  { %v772_v60 = vpop.f32.mrf.mxu3 }
 0x381   :  { %v788_v19 = vmul.f32 %v772_v60, %v1520_v4  ;;  %v802_v4 = vadd.f32 %v989_v39, %v785_v37  ;;  %v843_v6 = vadd.f32 %v1021_v25, %v842_v49 }
 0x383   :  { %v805_v61 = vadd.f32 %v989_v39, %v788_v19  ;;  %v847_v47 = vsel %vm846_vm1, %v1021_v25, %v843_v6 }
 0x384   :  { %v852_v15 = vsel %vm849_vm4, %v851_v10, %v847_v47 }
 0x385   :  { %821 = vmatpush.msrb.mxu0 %v805_v61 }
 0x387   :  { %822 = vmatpush.msrb.mxu0 %v804_v34 }
 0x389   :  { %823 = vmatpush.msrb.mxu0 %v803_v36 }
 0x38b   :  { %824 = vmatpush.msrb.mxu0 %v802_v4 }
 0x38d   :  { %825 = vmatpush.msrb.mxu0 %v801_v32 }
 0x38f   :  { %826 = vmatpush.msrb.mxu0 %v800_v21 }
 0x391   :  { %827 = vmatpush.msrb.mxu0 %v799_v13 }
 0x393   :  { %828 = vmatpush.msrb.mxu0 %v798_v40 }
 0x395   :  { %829 = vmatpush.msrb.mxu0 %v797_v44 }
 0x397   :  { %830 = vmatpush.msrb.mxu0 %v796_v59 }
 0x399   :  { %831 = vmatpush.msrb.mxu0 %v795_v29 }
 0x39b   :  { %832 = vmatpush.msrb.mxu0 %v794_v22 }
 0x39d   :  { %833 = vmatpush.msrb.mxu0 %v793_v55 }
 0x39f   :  { %834 = vmatpush.msrb.mxu0 %v792_v9 }
 0x3a0   :  { %984 = vmatmul.msk.f32.vlgmr.msrb.gmra.mxu0 %vm2024_vm2, %v983_v57 }
 0x41d   :  { %v836_v45 = vpop.f32.mrf.mxu0 }
 0x41e   :  { %v853_v20 = vmul.f32 %v852_v15, %v836_v45 }
 0x420   :  { %985 = vmatmul.msk.f32.vlgmr.msrb.gmra.mxu2 %vm600_vm0, %v853_v20 }
 0x4a3   :  { %v882_v31 = vpop.f32.mrf.mxu2 }
 0x4a4   :  { %v883_v2 = vadd.f32 %v991_v51, %v882_v31 }
 0x4a6   :  { %v886_v30 = vsel %vm885_vm12, %v883_v2, -inf }
 0x4a7   :  { %887 = vmax.xlane.f32.xlu0 %v886_v30 }
 0x51a   :  { %v888_v43 = vpop.xlane.xlu0 %887 }
 0x51b   :  { %v889_v54 = vsub.f32 %v883_v2, %v888_v43 }
 0x51d   :  { %v890_v62 = vmul.f32 1.442695, %v889_v54 }
 0x51f   :  { %1022 = vpow2.f32 %v890_v62 }
 0x525   :  { %v1023_v17 = vpop.eup %1022 }
 0x526   :  { %v892_v33 = vsel %vm885_vm12, %v1023_v17, 0.0 }
 0x527   :  { %893 = vadd.xlane.f32.xlu1 %v892_v33 }
 0x59a   :  { %v894_v28 = vpop.xlane.xlu1 %893 }
 0x59b   :  { %1024 = vrcp.f32 %v894_v28  ;;  %v906_v24 = vand.u32 2147483648, %v894_v28  ;;  %v904_v41 = vand.u32 2147483647, %v894_v28  ;;  %vm900_vm14 = vweird.f32 %v894_v28 }
 0x59d   :  { %v907_v52 = vor.u32 1.1754944e-38, %v906_v24  ;;  %vm905_vm7 = vcmp.eq.f32.partialorder %v904_v41, 8.507059e+37 }
 0x5a1   :  { %v1025_v26 = vpop.eup %1024 }
 0x5a2   :  { %v896_v50 = vmul.f32 %v1025_v26, %v894_v28  ;;  %vm901_vm0 = vweird.f32 %v1025_v26 }
 0x5a3   :  { %vm902_vm15 = vmor %vm900_vm14, %vm901_vm0 }
 0x5a4   :  { %v897_v57 = vsub.f32 1.0, %v896_v50 }
 0x5a6   :  { %v898_v14 = vmul.f32 %v1025_v26, %v897_v57 }
 0x5a8   :  { %v899_v60 = vadd.f32 %v1025_v26, %v898_v14 }
 0x5aa   :  { %v903_v63 = vsel %vm902_vm15, %v1025_v26, %v899_v60 }
 0x5ab   :  { %v908_v19 = vsel %vm905_vm7, %v907_v52, %v903_v63 }
 0x5ac   :  { %v909_v39 = vmul.f32 %v1023_v17, %v908_v19 }
 0x5ae   :  { %910 = vst.msk [vmem:[#allocation2] sm:$0x3] %vm885_vm12, %v909_v39 }
 0x5af   :  { %921 = dma.vmem_to_hbm [thread:$0]  %s917_s16, 32, %s919_s19, [#allocation3]  }
 0x5b0   :  { %1050 = dma.done.wait [#allocation3], 32  }
 0x5b1   :  { %1051 = vsyncadd [#allocation3], 4294967264 }
 0x5b2   :  { %926 = vsyncpa [#allocation3], 1 }

</bundles_post_ra>
